<compile_context>
chip_gen: v7x
topology: tpu7x:2x2x1
jax: 0.10.0
libtpu: 0.0.40
codegen_flags: <defaults>
</compile_context>

<pallas_src>
import jax
import jax.numpy as jnp
from jax.experimental import pallas as pl
from jax.experimental.pallas import tpu as pltpu

NUM_GROUPS = 32
EPS = 1e-5


# ----------------------------------------------------------------------------
# Fused GroupNorm(32) + SiLU + 3x3 "same" conv  [+ residual / 1x1-conv skip]
# ----------------------------------------------------------------------------
def _make_fused_kernel(H, W, Cin, Cout, skip_mode):
    """skip_mode in {"none", "identity", "conv"}."""
    HW = H * W
    cg = Cin // NUM_GROUPS
    inv_n = 1.0 / float(HW * cg)

    def kernel(*refs):
        if skip_mode == "conv":
            (x_ref, g_ref, b_ref, w_ref, bias_ref,
             res_ref, wsk_ref, bsk_ref, out_ref, pad_ref) = refs
        elif skip_mode == "identity":
            (x_ref, g_ref, b_ref, w_ref, bias_ref,
             res_ref, out_ref, pad_ref) = refs
        else:
            (x_ref, g_ref, b_ref, w_ref, bias_ref, out_ref, pad_ref) = refs

        x2d = x_ref[0].astype(jnp.float32)                      # (HW, Cin)

        # ---------------- GroupNorm statistics (single pass) ----------------
        s_c = jnp.sum(x2d, axis=0, keepdims=True)               # (1, Cin)
        ss_c = jnp.sum(x2d * x2d, axis=0, keepdims=True)        # (1, Cin)
        if cg == 1:                                             # group == channel
            mean_c = s_c * inv_n
            ex2_c = ss_c * inv_n
        else:
            # block-diagonal "same group" matrix built in-kernel (no HBM traffic)
            r = jax.lax.broadcasted_iota(jnp.int32, (Cin, Cin), 0) // cg
            c = jax.lax.broadcasted_iota(jnp.int32, (Cin, Cin), 1) // cg
            gmat = (r == c).astype(jnp.float32)
            mean_c = jnp.dot(s_c, gmat,
                             preferred_element_type=jnp.float32) * inv_n
            ex2_c = jnp.dot(ss_c, gmat,
                            preferred_element_type=jnp.float32) * inv_n
        var_c = ex2_c - mean_c * mean_c
        inv_c = jax.lax.rsqrt(var_c + EPS)
        scale = inv_c * g_ref[...]                              # (1, Cin)
        shift = b_ref[...] - mean_c * scale

        # normalize + SiLU (sigmoid via EUP exp + approx reciprocal)
        a = x2d * scale + shift
        a = a * pl.reciprocal(1.0 + jnp.exp(-a), approx=True)

        # ---------------- zero-padded activation in VMEM --------------------
        # only the 1-pixel border strips are (re)zeroed each step; the interior
        # is fully overwritten, so no stale data can leak between grid steps.
        pad_ref[0:1, :, :] = jnp.zeros((1, W + 2, Cin), jnp.float32)
        pad_ref[H + 1:H + 2, :, :] = jnp.zeros((1, W + 2, Cin), jnp.float32)
        pad_ref[:, 0:1, :] = jnp.zeros((H + 2, 1, Cin), jnp.float32)
        pad_ref[:, W + 1:W + 2, :] = jnp.zeros((H + 2, 1, Cin), jnp.float32)
        pad_ref[1:H + 1, 1:W + 1, :] = a.reshape(H, W, Cin)

        # ---------------- im2col: fold all 9 taps into K --------------------
        padded = pad_ref[...]                                   # single VMEM load
        taps = []
        for dy in range(3):
            for dx in range(3):
                taps.append(padded[dy:dy + H, dx:dx + W, :]
                            .reshape(HW, Cin).astype(jnp.bfloat16))
        col = jnp.concatenate(taps, axis=-1)                    # (HW, 9*Cin) bf16

        acc = jnp.dot(col, w_ref[...],                          # one MXU matmul
                      preferred_element_type=jnp.float32)       # K = 9*Cin
        acc = acc + bias_ref[...]                               # (1, Cout)

        # ---------------- fused residual / skip path ------------------------
        if skip_mode == "identity":
            acc = acc + res_ref[0].astype(jnp.float32)
        elif skip_mode == "conv":
            skip = jnp.dot(res_ref[0].astype(jnp.bfloat16), wsk_ref[...],
                           preferred_element_type=jnp.float32)
            acc = acc + skip + bsk_ref[...]

        out_ref[0] = acc.astype(out_ref.dtype)

    return kernel


def _fused_block(x_flat, gamma, beta, w, b, *, H, W, skip_mode="none",
                 res=None, w_skip=None, b_skip=None, out_dtype=None):
    """x_flat: (N, H*W, Cin) NHWC-flattened; w: (3, 3, Cin, Cout) HWIO.
    Returns (N, H*W, Cout)."""
    N, HW, Cin = x_flat.shape
    Cout = w.shape[-1]
    if out_dtype is None:
        out_dtype = x_flat.dtype

    kernel = _make_fused_kernel(H, W, Cin, Cout, skip_mode)

    # weights go to the MXU in bf16 (f32 accumulation); affine params stay f32.
    w9 = w.reshape(9 * Cin, Cout).astype(jnp.bfloat16)
    args = [x_flat,
            gamma.reshape(1, Cin).astype(jnp.float32),
            beta.reshape(1, Cin).astype(jnp.float32),
            w9,
            b.reshape(1, Cout).astype(jnp.float32)]
    in_specs = [
        pl.BlockSpec((1, HW, Cin), lambda n: (n, 0, 0)),
        pl.BlockSpec((1, Cin), lambda n: (0, 0)),
        pl.BlockSpec((1, Cin), lambda n: (0, 0)),
        pl.BlockSpec((9 * Cin, Cout), lambda n: (0, 0)),
        pl.BlockSpec((1, Cout), lambda n: (0, 0)),
    ]
    if skip_mode == "identity":
        args.append(res)
        in_specs.append(pl.BlockSpec((1, HW, Cout), lambda n: (n, 0, 0)))
    elif skip_mode == "conv":
        cres = res.shape[-1]
        args += [res,
                 w_skip.astype(jnp.bfloat16),
                 b_skip.reshape(1, Cout).astype(jnp.float32)]
        in_specs += [
            pl.BlockSpec((1, HW, cres), lambda n: (n, 0, 0)),
            pl.BlockSpec((cres, Cout), lambda n: (0, 0)),
            pl.BlockSpec((1, Cout), lambda n: (0, 0)),
        ]

    # TODO(synk): for large H*W*C (e.g. 64x64x512 on v7x's 64 MiB VMEM) add a
    # spatial grid axis with a 1-row halo plus a Cout-tile axis; grid=(N,) is
    # sufficient at these small shapes and keeps GroupNorm single-pass.
    return pl.pallas_call(
        kernel,
        out_shape=jax.ShapeDtypeStruct((N, HW, Cout), out_dtype),
        grid_spec=pltpu.PrefetchScalarGridSpec(
            num_scalar_prefetch=0,
            grid=(N,),
            in_specs=in_specs,
            out_specs=pl.BlockSpec((1, HW, Cout), lambda n: (n, 0, 0)),
            scratch_shapes=[pltpu.VMEM((H + 2, W + 2, Cin), jnp.float32)],
        ),
        compiler_params=pltpu.CompilerParams(
            dimension_semantics=("parallel",)),
    )(*args)


# ----------------------------------------------------------------------------
# RB forward: NCHW in / NCHW out (matches the PyTorch module).
# ----------------------------------------------------------------------------
def rb_forward(x_nchw, params):
    N, Cin, H, W = x_nchw.shape
    # TODO(synk): fold the NCHW<->NHWC boundary transposes into the first/last
    # kernels (or keep the whole network NHWC) to remove two full HBM passes.
    x = jnp.transpose(x_nchw, (0, 2, 3, 1)).reshape(N, H * W, Cin)

    # layer 1: GN + SiLU + 3x3 conv  (intermediate written in bf16)
    h = _fused_block(x, params["gn1_g"], params["gn1_b"],
                     params["w1"], params["b1"], H=H, W=W,
                     skip_mode="none", out_dtype=jnp.bfloat16)

    # layer 2: GN + SiLU + 3x3 conv  + fused skip path
    if params["w_skip"] is None:
        out = _fused_block(h, params["gn2_g"], params["gn2_b"],
                           params["w2"], params["b2"], H=H, W=W,
                           skip_mode="identity", res=x,
                           out_dtype=x_nchw.dtype)
    else:
        out = _fused_block(h, params["gn2_g"], params["gn2_b"],
                           params["w2"], params["b2"], H=H, W=W,
                           skip_mode="conv", res=x,
                           w_skip=params["w_skip"], b_skip=params["b_skip"],
                           out_dtype=x_nchw.dtype)

    Cout = out.shape[-1]
    return jnp.transpose(out.reshape(N, H, W, Cout), (0, 3, 1, 2))


def init_params(key, cin, cout):
    ks = jax.random.split(key, 8)
    p = {
        "gn1_g": 1.0 + 0.1 * jax.random.normal(ks[0], (cin,), jnp.float32),
        "gn1_b": 0.1 * jax.random.normal(ks[1], (cin,), jnp.float32),
        "w1": 0.05 * jax.random.normal(ks[2], (3, 3, cin, cout), jnp.float32),
        "b1": 0.05 * jax.random.normal(ks[3], (cout,), jnp.float32),
        "gn2_g": 1.0 + 0.1 * jax.random.normal(ks[4], (cout,), jnp.float32),
        "gn2_b": 0.1 * jax.random.normal(ks[5], (cout,), jnp.float32),
        "w2": 0.05 * jax.random.normal(ks[6], (3, 3, cout, cout), jnp.float32),
        "b2": 0.05 * jax.random.normal(ks[7], (cout,), jnp.float32),
    }
    if cin == cout:
        p["w_skip"] = None
        p["b_skip"] = None
    else:
        k1, k2 = jax.random.split(ks[0])
        p["w_skip"] = 0.05 * jax.random.normal(k1, (cin, cout), jnp.float32)
        p["b_skip"] = 0.05 * jax.random.normal(k2, (cout,), jnp.float32)
    return p


# ----------------------------------------------------------------------------
# Pure-JAX reference (correctness check only)
# ----------------------------------------------------------------------------
def _ref_gn_silu(x, gamma, beta):
    N, C, H, W = x.shape
    xg = x.reshape(N, NUM_GROUPS, C // NUM_GROUPS, H, W)
    mean = xg.mean(axis=(2, 3, 4), keepdims=True)
    var = xg.var(axis=(2, 3, 4), keepdims=True)
    xn = ((xg - mean) / jnp.sqrt(var + EPS)).reshape(N, C, H, W)
    xn = xn * gamma[None, :, None, None] + beta[None, :, None, None]
    return xn * jax.nn.sigmoid(xn)


def _ref_conv(x, w_hwio, b, pad):
    w_oihw = jnp.transpose(w_hwio, (3, 2, 0, 1))
    out = jax.lax.conv_general_dilated(
        x, w_oihw, window_strides=(1, 1),
        padding=((pad, pad), (pad, pad)),
        dimension_numbers=("NCHW", "OIHW", "NCHW"))
    return out + b[None, :, None, None]


def rb_reference(x, p):
    h = _ref_conv(_ref_gn_silu(x, p["gn1_g"], p["gn1_b"]), p["w1"], p["b1"], 1)
    h = _ref_conv(_ref_gn_silu(h, p["gn2_g"], p["gn2_b"]), p["w2"], p["b2"], 1)
    if p["w_skip"] is None:
        return h + x
    skip = _ref_conv(x, p["w_skip"].reshape(1, 1, *p["w_skip"].shape),
                     p["b_skip"], 0)
    return h + skip


if __name__ == "__main__":
    key = jax.random.PRNGKey(0)

    # --- case 1: Cin != Cout  (fused 1x1-conv skip) --------------------------
    N, Cin, Cout, H, W = 2, 32, 64, 16, 16
    kx, kp = jax.random.split(key)
    x = jax.random.normal(kx, (N, Cin, H, W), jnp.float32)   # NCHW like PyTorch
    params = init_params(kp, Cin, Cout)

    out = jax.block_until_ready(rb_forward(x, params))
    assert out.shape == (N, Cout, H, W), out.shape
    ref = rb_reference(x, params)
    assert jnp.all(jnp.isfinite(out))
    assert jnp.allclose(out, ref, rtol=5e-2, atol=5e-2), \
        float(jnp.max(jnp.abs(out - ref)))

    # --- case 2: Cin == Cout  (fused identity skip) ---------------------------
    kx2, kp2 = jax.random.split(kp)
    x2 = jax.random.normal(kx2, (N, Cin, H, W), jnp.float32)
    params2 = init_params(kp2, Cin, Cin)
    out2 = jax.block_until_ready(rb_forward(x2, params2))
    ref2 = rb_reference(x2, params2)
    assert jnp.all(jnp.isfinite(out2))
    assert jnp.allclose(out2, ref2, rtol=5e-2, atol=5e-2), \
        float(jnp.max(jnp.abs(out2 - ref2)))

    print("KERNEL_OK")
</pallas_src>

<mosaic_0001>
module attributes {stable_mosaic.version = 11 : i64} {
  func.func @kernel(%arg0: i32, %arg1: memref<1x256x32xf32, #tpu.memory_space<vmem>>, %arg2: memref<1x32xf32, #tpu.memory_space<vmem>>, %arg3: memref<1x32xf32, #tpu.memory_space<vmem>>, %arg4: memref<288x64xbf16, #tpu.memory_space<vmem>>, %arg5: memref<1x64xf32, #tpu.memory_space<vmem>>, %arg6: memref<1x256x64xbf16, #tpu.memory_space<vmem>>, %arg7: memref<18x18x32xf32, #tpu.memory_space<vmem>>) attributes {dimension_semantics = [#tpu.dimension_semantics<parallel>], iteration_bounds = array<i64: 2>, scalar_prefetch = 0 : i64, scratch_operands = 1 : i64, tpu.core_type = #tpu.core_type<tc>, window_params = [{transform_indices = @transform_0, window_bounds = array<i64: 1, 256, 32>}, {pipeline_mode = #tpu.pipeline_mode<synchronous>, transform_indices = @transform_1, window_bounds = array<i64: 1, 32>}, {pipeline_mode = #tpu.pipeline_mode<synchronous>, transform_indices = @transform_2, window_bounds = array<i64: 1, 32>}, {pipeline_mode = #tpu.pipeline_mode<synchronous>, transform_indices = @transform_3, window_bounds = array<i64: 288, 64>}, {pipeline_mode = #tpu.pipeline_mode<synchronous>, transform_indices = @transform_4, window_bounds = array<i64: 1, 64>}, {transform_indices = @transform_5, window_bounds = array<i64: 1, 256, 64>}]} {
    %c0 = arith.constant 0 : index
    %c0_0 = arith.constant 0 : index
    %c0_1 = arith.constant 0 : index
    %0 = vector.load %arg1[%c0, %c0_0, %c0_1] : memref<1x256x32xf32, #tpu.memory_space<vmem>>, vector<1x256x32xf32>
    %1 = vector.shape_cast %0 : vector<1x256x32xf32> to vector<256x32xf32>
    %cst = arith.constant dense<0.000000e+00> : vector<32xf32>
    %2 = vector.multi_reduction <add>, %1, %cst [0] : vector<256x32xf32> to vector<32xf32>
    %3 = vector.shape_cast %2 : vector<32xf32> to vector<1x32xf32>
    %4 = arith.mulf %1, %1 : vector<256x32xf32>
    %cst_2 = arith.constant dense<0.000000e+00> : vector<32xf32>
    %5 = vector.multi_reduction <add>, %4, %cst_2 [0] : vector<256x32xf32> to vector<32xf32>
    %6 = vector.shape_cast %5 : vector<32xf32> to vector<1x32xf32>
    %cst_3 = arith.constant 3.906250e-03 : f32
    %7 = vector.broadcast %cst_3 : f32 to vector<1x32xf32>
    %8 = arith.mulf %3, %7 : vector<1x32xf32>
    %cst_4 = arith.constant 3.906250e-03 : f32
    %9 = vector.broadcast %cst_4 : f32 to vector<1x32xf32>
    %10 = arith.mulf %6, %9 : vector<1x32xf32>
    %11 = arith.mulf %8, %8 : vector<1x32xf32>
    %12 = arith.subf %10, %11 : vector<1x32xf32>
    %cst_5 = arith.constant 9.99999974E-6 : f32
    %13 = vector.broadcast %cst_5 : f32 to vector<1x32xf32>
    %14 = arith.addf %12, %13 : vector<1x32xf32>
    %15 = math.rsqrt %14 : vector<1x32xf32>
    %c0_6 = arith.constant 0 : index
    %c0_7 = arith.constant 0 : index
    %16 = vector.load %arg2[%c0_6, %c0_7] : memref<1x32xf32, #tpu.memory_space<vmem>>, vector<1x32xf32>
    %17 = arith.mulf %15, %16 : vector<1x32xf32>
    %c0_8 = arith.constant 0 : index
    %c0_9 = arith.constant 0 : index
    %18 = vector.load %arg3[%c0_8, %c0_9] : memref<1x32xf32, #tpu.memory_space<vmem>>, vector<1x32xf32>
    %19 = arith.mulf %8, %17 : vector<1x32xf32>
    %20 = arith.subf %18, %19 : vector<1x32xf32>
    %21 = vector.broadcast %17 : vector<1x32xf32> to vector<256x32xf32>
    %22 = arith.mulf %1, %21 : vector<256x32xf32>
    %23 = vector.broadcast %20 : vector<1x32xf32> to vector<256x32xf32>
    %24 = arith.addf %22, %23 : vector<256x32xf32>
    %cst_10 = arith.constant 0.000000e+00 : f32
    %25 = vector.broadcast %cst_10 : f32 to vector<256x32xf32>
    %26 = arith.subf %25, %24 : vector<256x32xf32>
    %27 = math.exp %26 : vector<256x32xf32>
    %cst_11 = arith.constant 1.000000e+00 : f32
    %28 = vector.broadcast %cst_11 : f32 to vector<256x32xf32>
    %29 = arith.addf %28, %27 : vector<256x32xf32>
    %30 = tpu.reciprocal %29 {approx = true} : vector<256x32xf32> -> vector<256x32xf32>
    %31 = arith.mulf %24, %30 : vector<256x32xf32>
    %cst_12 = arith.constant 0.000000e+00 : f32
    %32 = vector.broadcast %cst_12 : f32 to vector<1x18x32xf32>
    %c0_13 = arith.constant 0 : index
    %c0_14 = arith.constant 0 : index
    %c0_15 = arith.constant 0 : index
    %33 = vector.load %arg7[%c0_13, %c0_14, %c0_15] : memref<18x18x32xf32, #tpu.memory_space<vmem>>, vector<1x18x32xf32>
    tpu.vector_store %arg7[%c0_13, %c0_14, %c0_15], %32 {strides = array<i32>} : memref<18x18x32xf32, #tpu.memory_space<vmem>>, vector<1x18x32xf32>,
    %cst_16 = arith.constant 0.000000e+00 : f32
    %34 = vector.broadcast %cst_16 : f32 to vector<1x18x32xf32>
    %c17 = arith.constant 17 : index
    %c0_17 = arith.constant 0 : index
    %c0_18 = arith.constant 0 : index
    %35 = vector.load %arg7[%c17, %c0_17, %c0_18] : memref<18x18x32xf32, #tpu.memory_space<vmem>>, vector<1x18x32xf32>
    tpu.vector_store %arg7[%c17, %c0_17, %c0_18], %34 {strides = array<i32>} : memref<18x18x32xf32, #tpu.memory_space<vmem>>, vector<1x18x32xf32>,
    %cst_19 = arith.constant 0.000000e+00 : f32
    %36 = vector.broadcast %cst_19 : f32 to vector<18x1x32xf32>
    %c0_20 = arith.constant 0 : index
    %c0_21 = arith.constant 0 : index
    %c0_22 = arith.constant 0 : index
    %37 = vector.load %arg7[%c0_20, %c0_21, %c0_22] : memref<18x18x32xf32, #tpu.memory_space<vmem>>, vector<18x1x32xf32>
    tpu.vector_store %arg7[%c0_20, %c0_21, %c0_22], %36 {strides = array<i32>} : memref<18x18x32xf32, #tpu.memory_space<vmem>>, vector<18x1x32xf32>,
    %cst_23 = arith.constant 0.000000e+00 : f32
    %38 = vector.broadcast %cst_23 : f32 to vector<18x1x32xf32>
    %c0_24 = arith.constant 0 : index
    %c17_25 = arith.constant 17 : index
    %c0_26 = arith.constant 0 : index
    %39 = vector.load %arg7[%c0_24, %c17_25, %c0_26] : memref<18x18x32xf32, #tpu.memory_space<vmem>>, vector<18x1x32xf32>
    tpu.vector_store %arg7[%c0_24, %c17_25, %c0_26], %38 {strides = array<i32>} : memref<18x18x32xf32, #tpu.memory_space<vmem>>, vector<18x1x32xf32>,
    %40 = vector.shape_cast %31 : vector<256x32xf32> to vector<16x16x32xf32>
    %c1 = arith.constant 1 : index
    %c1_27 = arith.constant 1 : index
    %c0_28 = arith.constant 0 : index
    %41 = vector.load %arg7[%c1, %c1_27, %c0_28] : memref<18x18x32xf32, #tpu.memory_space<vmem>>, vector<16x16x32xf32>
    tpu.vector_store %arg7[%c1, %c1_27, %c0_28], %40 {strides = array<i32>} : memref<18x18x32xf32, #tpu.memory_space<vmem>>, vector<16x16x32xf32>,
    %c0_29 = arith.constant 0 : index
    %c0_30 = arith.constant 0 : index
    %c0_31 = arith.constant 0 : index
    %42 = vector.load %arg7[%c0_29, %c0_30, %c0_31] : memref<18x18x32xf32, #tpu.memory_space<vmem>>, vector<18x18x32xf32>
    %43 = vector.extract_strided_slice %42 {offsets = [0, 0, 0], sizes = [16, 16, 32], strides = [1, 1, 1]} : vector<18x18x32xf32> to vector<16x16x32xf32>
    %44 = vector.shape_cast %43 : vector<16x16x32xf32> to vector<256x32xf32>
    %45 = arith.truncf %44 : vector<256x32xf32> to vector<256x32xbf16>
    %46 = vector.extract_strided_slice %42 {offsets = [0, 1, 0], sizes = [16, 16, 32], strides = [1, 1, 1]} : vector<18x18x32xf32> to vector<16x16x32xf32>
    %47 = vector.shape_cast %46 : vector<16x16x32xf32> to vector<256x32xf32>
    %48 = arith.truncf %47 : vector<256x32xf32> to vector<256x32xbf16>
    %49 = vector.extract_strided_slice %42 {offsets = [0, 2, 0], sizes = [16, 16, 32], strides = [1, 1, 1]} : vector<18x18x32xf32> to vector<16x16x32xf32>
    %50 = vector.shape_cast %49 : vector<16x16x32xf32> to vector<256x32xf32>
    %51 = arith.truncf %50 : vector<256x32xf32> to vector<256x32xbf16>
    %52 = vector.extract_strided_slice %42 {offsets = [1, 0, 0], sizes = [16, 16, 32], strides = [1, 1, 1]} : vector<18x18x32xf32> to vector<16x16x32xf32>
    %53 = vector.shape_cast %52 : vector<16x16x32xf32> to vector<256x32xf32>
    %54 = arith.truncf %53 : vector<256x32xf32> to vector<256x32xbf16>
    %55 = vector.extract_strided_slice %42 {offsets = [1, 1, 0], sizes = [16, 16, 32], strides = [1, 1, 1]} : vector<18x18x32xf32> to vector<16x16x32xf32>
    %56 = vector.shape_cast %55 : vector<16x16x32xf32> to vector<256x32xf32>
    %57 = arith.truncf %56 : vector<256x32xf32> to vector<256x32xbf16>
    %58 = vector.extract_strided_slice %42 {offsets = [1, 2, 0], sizes = [16, 16, 32], strides = [1, 1, 1]} : vector<18x18x32xf32> to vector<16x16x32xf32>
    %59 = vector.shape_cast %58 : vector<16x16x32xf32> to vector<256x32xf32>
    %60 = arith.truncf %59 : vector<256x32xf32> to vector<256x32xbf16>
    %61 = vector.extract_strided_slice %42 {offsets = [2, 0, 0], sizes = [16, 16, 32], strides = [1, 1, 1]} : vector<18x18x32xf32> to vector<16x16x32xf32>
    %62 = vector.shape_cast %61 : vector<16x16x32xf32> to vector<256x32xf32>
    %63 = arith.truncf %62 : vector<256x32xf32> to vector<256x32xbf16>
    %64 = vector.extract_strided_slice %42 {offsets = [2, 1, 0], sizes = [16, 16, 32], strides = [1, 1, 1]} : vector<18x18x32xf32> to vector<16x16x32xf32>
    %65 = vector.shape_cast %64 : vector<16x16x32xf32> to vector<256x32xf32>
    %66 = arith.truncf %65 : vector<256x32xf32> to vector<256x32xbf16>
    %67 = vector.extract_strided_slice %42 {offsets = [2, 2, 0], sizes = [16, 16, 32], strides = [1, 1, 1]} : vector<18x18x32xf32> to vector<16x16x32xf32>
    %68 = vector.shape_cast %67 : vector<16x16x32xf32> to vector<256x32xf32>
    %69 = arith.truncf %68 : vector<256x32xf32> to vector<256x32xbf16>
    %70 = tpu.concatenate %45, %48, %51, %54, %57, %60, %63, %66, %69 in 1 : vector<256x32xbf16>, vector<256x32xbf16>, vector<256x32xbf16>, vector<256x32xbf16>, vector<256x32xbf16>, vector<256x32xbf16>, vector<256x32xbf16>, vector<256x32xbf16>, vector<256x32xbf16> -> vector<256x288xbf16>
    %c0_32 = arith.constant 0 : index
    %c0_33 = arith.constant 0 : index
    %71 = vector.load %arg4[%c0_32, %c0_33] : memref<288x64xbf16, #tpu.memory_space<vmem>>, vector<288x64xbf16>
    %cst_34 = arith.constant dense<0.000000e+00> : vector<256x64xf32>
    %72 = tpu.matmul %70, %71, %cst_34 {dimension_numbers = #tpu.dot_dimension_numbers<[1], [0], [0], [1], [0, 0, 1, 1], [], []>} : vector<256x288xbf16>, vector<288x64xbf16>, vector<256x64xf32> -> vector<256x64xf32>
    %c0_35 = arith.constant 0 : index
    %c0_36 = arith.constant 0 : index
    %73 = vector.load %arg5[%c0_35, %c0_36] : memref<1x64xf32, #tpu.memory_space<vmem>>, vector<1x64xf32>
    %74 = vector.broadcast %73 : vector<1x64xf32> to vector<256x64xf32>
    %75 = arith.addf %72, %74 : vector<256x64xf32>
    %76 = arith.truncf %75 : vector<256x64xf32> to vector<256x64xbf16>
    %c0_37 = arith.constant 0 : index
    %c0_38 = arith.constant 0 : index
    %c0_39 = arith.constant 0 : index
    %77 = vector.load %arg6[%c0_37, %c0_38, %c0_39] : memref<1x256x64xbf16, #tpu.memory_space<vmem>>, vector<1x256x64xbf16>
    %78 = vector.shape_cast %77 : vector<1x256x64xbf16> to vector<256x64xbf16>
    %79 = vector.shape_cast %76 : vector<256x64xbf16> to vector<1x256x64xbf16>
    tpu.vector_store %arg6[%c0_37, %c0_38, %c0_39], %79 {strides = array<i32>} : memref<1x256x64xbf16, #tpu.memory_space<vmem>>, vector<1x256x64xbf16>,
    return
  }
  func.func @transform_0(%arg0: i32) -> (i32, i32, i32) {
    %c0_i32 = arith.constant 0 : i32
    %c0_i32_0 = arith.constant 0 : i32
    %c0_i32_1 = arith.constant 0 : i32
    return %arg0, %c0_i32, %c0_i32_0 : i32, i32, i32
  }
  func.func @transform_1(%arg0: i32) -> (i32, i32) {
    %c0_i32 = arith.constant 0 : i32
    %c0_i32_0 = arith.constant 0 : i32
    %c0_i32_1 = arith.constant 0 : i32
    return %c0_i32, %c0_i32_0 : i32, i32
  }
  func.func @transform_2(%arg0: i32) -> (i32, i32) {
    %c0_i32 = arith.constant 0 : i32
    %c0_i32_0 = arith.constant 0 : i32
    %c0_i32_1 = arith.constant 0 : i32
    return %c0_i32, %c0_i32_0 : i32, i32
  }
  func.func @transform_3(%arg0: i32) -> (i32, i32) {
    %c0_i32 = arith.constant 0 : i32
    %c0_i32_0 = arith.constant 0 : i32
    %c0_i32_1 = arith.constant 0 : i32
    return %c0_i32, %c0_i32_0 : i32, i32
  }
  func.func @transform_4(%arg0: i32) -> (i32, i32) {
    %c0_i32 = arith.constant 0 : i32
    %c0_i32_0 = arith.constant 0 : i32
    %c0_i32_1 = arith.constant 0 : i32
    return %c0_i32, %c0_i32_0 : i32, i32
  }
  func.func @transform_5(%arg0: i32) -> (i32, i32, i32) {
    %c0_i32 = arith.constant 0 : i32
    %c0_i32_0 = arith.constant 0 : i32
    %c0_i32_1 = arith.constant 0 : i32
    return %arg0, %c0_i32, %c0_i32_0 : i32, i32, i32
  }
}

</mosaic_0001>

<bundles_post_ra>
// kernel: tpu_custom_call.1
= control target key start
LH: loop header
LB: loop body
LE: loop exit
PB: predicated region body
PF: predicated region fallthrough
CT: control target
= control target key end

     0   :  { %s2942_s18 = smov 0   ;;  %s4654_s0 = inlined_call_operand.vmem [shape: f32[2,256,32], index: 0, kind: input, shape index: {}]   ;;  %s4655_s1 = inlined_call_operand.vmem [shape: f32[1,32], index: 1, kind: input, shape index: {}]   ;;  %s4656_s2 = inlined_call_operand.vmem [shape: f32[1,32], index: 2, kind: input, shape index: {}]   ;;  %s4657_s3 = inlined_call_operand.vmem [shape: bf16[288,64], index: 3, kind: input, shape index: {}]   ;;  %s4658_s4 = inlined_call_operand.vmem [shape: f32[1,64], index: 4, kind: input, shape index: {}]   ;;  %s4659_s5 = inlined_call_operand.vmem [shape: bf16[2,256,64], index: 5, kind: output, shape index: {}]  }
   0x1 LB: > { %s2439_s19 = sadd.s32 4294967295, %s2906_s18   ;;  %p2443_p0 = scmp.ge.s32.totalorder %s2906_s18, 1  ;;  %s2906_s18 = sphi %s2942_s18, %s15_s18  }
   0x2   : > { %p187_p1 = scmp.lt.s32.totalorder %s2906_s18, 3 }
   0x4   : > { %p188_p2 = pnand %p2443_p0, %p187_p1 }
   0x6   : > { %191 = sbr.rel (%p188_p2) target bundleno = 726 (0x2d6), region = 40 }
   0xd   : > { %vm258_vm0 = vcmask 261120   ;;  %vm714_vm1 = vcmask 253952   ;;  %vm708_vm2 = vcmask 254976   ;;  %v2908_v0 = vmov 0.0   ;;  %p215_p3 = scmp.lt.s32.totalorder %s2439_s19, 1  ;;  %s2909_s24 = smov 64  }
   0xe   : > { %711 = vst.msk [vmem:[#allocation2 + $0x198] sm:$0xff] %vm258_vm0, %v2908_v0  ;;  %712 = vst.msk [vmem:[#allocation2 + $0x1a0] sm:$0xff] %vm258_vm0, %v2908_v0  ;;  %vm902_vm3 = vcmask 1046528   ;;  %vm1031_vm4 = vcmask 1045504   ;;  %s2910_s25 = smov 32   ;;  %s2911_s26 = smov 96  }
   0xf   : > { %706 = vst.msk [vmem:[#allocation2] sm:$0xff] %vm258_vm0, %v2908_v0  ;;  %707 = vst.msk [vmem:[#allocation2 + $0x8] sm:$0xff] %vm258_vm0, %v2908_v0  ;;  %s4780_s19 = smov (!%p215_p3, %s2439_s19), 1  ;;  %vm1492_vm5 = vcmask 523264   ;;  %vm1525_vm6 = vcmask 785408   ;;  %vm2351_vm7 = vcmask 519168  }
  0x10   : > { %716 = vst.msk [vmem:[#allocation2 + $0x18] sm:$0x1] %vm714_vm1, %v2908_v0  ;;  %717 = vst.msk [vmem:[#allocation2 + $0x30] sm:$0x1] %vm714_vm1, %v2908_v0  ;;  %s2517_s20 = sshll.u32 %s4780_s19, 8 }
  0x11   : > { %718 = vst.msk [vmem:[#allocation2 + $0x48] sm:$0x1] %vm714_vm1, %v2908_v0  ;;  %719 = vst.msk [vmem:[#allocation2 + $0x60] sm:$0x1] %vm714_vm1, %v2908_v0  ;;  %s3002_s23 = scalar_lea.vmem %s4654_s0, %s2517_s20 }
  0x12   : > { %720 = vst.msk [vmem:[#allocation2 + $0x78] sm:$0x1] %vm714_vm1, %v2908_v0  ;;  %721 = vst.msk [vmem:[#allocation2 + $0x90] sm:$0x1] %vm714_vm1, %v2908_v0  ;;  %v3005_v1 = vld [vmem:[%s3002_s23] sm:$0xff]  ;;  %v3008_v2 = vld [vmem:[%s3002_s23 + $0x8] sm:$0xff] }
  0x13   : > { %722 = vst.msk [vmem:[#allocation2 + $0xa8] sm:$0x1] %vm714_vm1, %v2908_v0  ;;  %723 = vst.msk [vmem:[#allocation2 + $0xc0] sm:$0x1] %vm714_vm1, %v2908_v0  ;;  %v3011_v3 = vld [vmem:[%s3002_s23 + $0x10] sm:$0xff]  ;;  %v259_v6 = vsel %vm258_vm0, %v3005_v1, 0.0  ;;  %v328_v62 = vmul.f32 %v3005_v1, %v3005_v1  ;;  %v329_v63 = vmul.f32 %v3008_v2, %v3008_v2 }
  0x14   : > { %724 = vst.msk [vmem:[#allocation2 + $0xd8] sm:$0x1] %vm714_vm1, %v2908_v0  ;;  %725 = vst.msk [vmem:[#allocation2 + $0xf0] sm:$0x1] %vm714_vm1, %v2908_v0  ;;  %v260_v7 = vsel %vm258_vm0, %v3008_v2, 0.0  ;;  %v262_v17 = vsel %vm258_vm0, %v3011_v3, 0.0 }
  0x15   : > { %726 = vst.msk [vmem:[#allocation2 + $0x108] sm:$0x1] %vm714_vm1, %v2908_v0  ;;  %727 = vst.msk [vmem:[#allocation2 + $0x120] sm:$0x1] %vm714_vm1, %v2908_v0  ;;  %v836_v4 = vld [vmem:[#allocation2 + $0x1a0] sm:$0xff]  ;;  %v261_v12 = vadd.f32 %v260_v7, %v259_v6  ;;  %v3020_v22 = vld [vmem:[%s3002_s23 + $0x18] sm:$0xff] }
  0x16   : > { %728 = vst.msk [vmem:[#allocation2 + $0x138] sm:$0x1] %vm714_vm1, %v2908_v0  ;;  %729 = vst.msk [vmem:[#allocation2 + $0x150] sm:$0x1] %vm714_vm1, %v2908_v0  ;;  %v785_v5 = vld [vmem:[#allocation2 + $0x8] sm:$0xff]  ;;  %v1185_v9 = vrot.slane %v836_v4, 1 }
  0x17   : > { %730 = vst.msk [vmem:[#allocation2 + $0x168] sm:$0x1] %vm714_vm1, %v2908_v0  ;;  %731 = vst.msk [vmem:[#allocation2 + $0x180] sm:$0x1] %vm714_vm1, %v2908_v0  ;;  %v904_v18 = vrot.slane %v785_v5, 1  ;;  %v1033_v21 = vrot.slane %v785_v5, 2  ;;  %v263_v31 = vadd.f32 %v262_v17, %v261_v12  ;;  %v331_v5 = vmul.f32 %v3020_v22, %v3020_v22 }
  0x18   : > { %734 = vst.msk [vmem:[#allocation2 + $0x29] sm:$0x1] %vm714_vm1, %v2908_v0  ;;  %735 = vst.msk [vmem:[#allocation2 + $0x41] sm:$0x1] %vm714_vm1, %v2908_v0  ;;  %v3025_v26 = vld [vmem:[%s3002_s23 + $0x20] sm:$0xff]  ;;  %v3031_v30 = vld [vmem:[%s3002_s23 + $0x28] sm:$0xff] }
  0x19   : > { %736 = vst.msk [vmem:[#allocation2 + $0x59] sm:$0x1] %vm714_vm1, %v2908_v0  ;;  %737 = vst.msk [vmem:[#allocation2 + $0x71] sm:$0x1] %vm714_vm1, %v2908_v0  ;;  %v264_v35 = vsel %vm258_vm0, %v3020_v22, 0.0  ;;  %v3038_v37 = vld [vmem:[%s3002_s23 + $0x30] sm:$0xff]  ;;  %v333_v17 = vmul.f32 %v3031_v30, %v3031_v30 }
  0x1a   : > { %738 = vst.msk [vmem:[#allocation2 + $0x89] sm:$0x1] %vm714_vm1, %v2908_v0  ;;  %739 = vst.msk [vmem:[#allocation2 + $0xa1] sm:$0x1] %vm714_vm1, %v2908_v0  ;;  %v265_v38 = vadd.f32 %v264_v35, %v263_v31  ;;  %v266_v39 = vsel %vm258_vm0, %v3025_v26, 0.0  ;;  %v268_v41 = vsel %vm258_vm0, %v3031_v30, 0.0 }
  0x1b   : > { %740 = vst.msk [vmem:[#allocation2 + $0xb9] sm:$0x1] %vm714_vm1, %v2908_v0  ;;  %741 = vst.msk [vmem:[#allocation2 + $0xd1] sm:$0x1] %vm714_vm1, %v2908_v0  ;;  %v3047_v42 = vld [vmem:[%s3002_s23 + $0x38] sm:$0xff]  ;;  %v270_v44 = vsel %vm258_vm0, %v3038_v37, 0.0 }
  0x1c   : > { %742 = vst.msk [vmem:[#allocation2 + $0xe9] sm:$0x1] %vm714_vm1, %v2908_v0  ;;  %743 = vst.msk [vmem:[#allocation2 + $0x101] sm:$0x1] %vm714_vm1, %v2908_v0  ;;  %v267_v43 = vadd.f32 %v266_v39, %v265_v38  ;;  %v3052_v45 = vld [vmem:[%s3002_s23 + $0x40] sm:$0xff]  ;;  %v3056_v47 = vld [vmem:[%s3002_s23 + $0x48] sm:$0xff] }
  0x1d   : > { %744 = vst.msk [vmem:[#allocation2 + $0x119] sm:$0x1] %vm714_vm1, %v2908_v0  ;;  %745 = vst.msk [vmem:[#allocation2 + $0x131] sm:$0x1] %vm714_vm1, %v2908_v0  ;;  %v3059_v48 = vld [vmem:[%s3002_s23 + $0x50] sm:$0xff]  ;;  %v272_v49 = vsel %vm258_vm0, %v3047_v42, 0.0  ;;  %v336_v39 = vmul.f32 %v3052_v45, %v3052_v45 }
  0x1e   : > { %746 = vst.msk [vmem:[#allocation2 + $0x149] sm:$0x1] %vm714_vm1, %v2908_v0  ;;  %747 = vst.msk [vmem:[#allocation2 + $0x161] sm:$0x1] %vm714_vm1, %v2908_v0  ;;  %v269_v46 = vadd.f32 %v268_v41, %v267_v43  ;;  %v3064_v50 = vld [vmem:[%s3002_s23 + $0x58] sm:$0xff]  ;;  %v3067_v51 = vld [vmem:[%s3002_s23 + $0x60] sm:$0xff] }
  0x1f   : > { %748 = vst.msk [vmem:[#allocation2 + $0x179] sm:$0x1] %vm714_vm1, %v2908_v0  ;;  %749 = vst.msk [vmem:[#allocation2 + $0x191] sm:$0x1] %vm714_vm1, %v2908_v0  ;;  %v274_v53 = vsel %vm258_vm0, %v3052_v45, 0.0  ;;  %v276_v55 = vsel %vm258_vm0, %v3056_v47, 0.0 }
  0x20   : > { %709 = vst.msk [vmem:[#allocation2 + $0x10] sm:$0x3] %vm708_vm2, %v2908_v0  ;;  %713 = vst.msk [vmem:[#allocation2 + $0x1a8] sm:$0x3] %vm708_vm2, %v2908_v0  ;;  %v271_v52 = vadd.f32 %v270_v44, %v269_v46  ;;  %v278_v56 = vsel %vm258_vm0, %v3059_v48, 0.0  ;;  %v280_v57 = vsel %vm258_vm0, %v3064_v50, 0.0 }
  0x21   : > { %732 = vst.msk [vmem:[#allocation2 + $0x198] sm:$0x1] %vm714_vm1, %v2908_v0  ;;  %715 = vst.msk [vmem:[#allocation2] sm:$0x1] %vm714_vm1, %v2908_v0  ;;  %v282_v58 = vsel %vm258_vm0, %v3067_v51, 0.0  ;;  %v3080_v60 = vld [vmem:[%s3002_s23 + $0x68] sm:$0xff] }
  0x22   : > { %733 = vst.msk [vmem:[#allocation2 + $0x11] sm:$0x1] %vm714_vm1, %v2908_v0  ;;  %750 = vst.msk [vmem:[#allocation2 + $0x1a9] sm:$0x1] %vm714_vm1, %v2908_v0  ;;  %v273_v54 = vadd.f32 %v272_v49, %v271_v52  ;;  %v330_v0 = vmul.f32 %v3011_v3, %v3011_v3  ;;  %v3091_v6 = vld [vmem:[%s3002_s23 + $0x70] sm:$0xff]  ;;  %v3133_v41 = vld [vmem:[%s3002_s23 + $0x98] sm:$0xff]  ;;  %v337_v49 = vmul.f32 %v3056_v47, %v3056_v47 }
  0x24   : > { %v275_v59 = vadd.f32 %v274_v53, %v273_v54  ;;  %v363_v12 = vsel %vm258_vm0, %v330_v0, 0.0  ;;  %v3141_v53 = vld [vmem:[%s3002_s23 + $0xa0] sm:$0xff]  ;;  %v339_v0 = vmul.f32 %v3064_v50, %v3064_v50 }
  0x26   : > { %v277_v61 = vadd.f32 %v276_v55, %v275_v59  ;;  %v3149_v59 = vld [vmem:[%s3002_s23 + $0xa8] sm:$0xff] }
  0x28   : > { %v835_v8 = vld [vmem:[#allocation2 + $0x198] sm:$0xff]  ;;  %v784_v10 = vld [vmem:[#allocation2] sm:$0xff] }
  0x29   : > { %v786_v11 = vld [vmem:[#allocation2 + $0x10] sm:$0x3]  ;;  %v1180_v13 = vpack.c.bf16 %v836_v4, %v835_v8  ;;  %v1184_v14 = vrot.slane %v835_v8, 1  ;;  %v903_v15 = vrot.slane %v784_v10, 1  ;;  %v837_v16 = vld [vmem:[#allocation2 + $0x1a8] sm:$0x3]  ;;  %v279_v4 = vadd.f32 %v278_v56, %v277_v61 }
  0x2a   : > { %v906_v19 = vrot.slane %v786_v11, 1  ;;  %v1032_v20 = vrot.slane %v784_v10, 2  ;;  %v1035_v23 = vrot.slane %v786_v11, 2  ;;  %v1187_v25 = vrot.slane %v837_v16, 1 }
  0x2b   : > { %1408 = vrot.lane.b32.xlu0 %v1180_v13, %s2909_s24  ;;  %v1186_v24 = vsel %vm902_vm3, %v1184_v14, %v1185_v9  ;;  %v905_v27 = vsel %vm902_vm3, %v903_v15, %v904_v18  ;;  %v281_v7 = vadd.f32 %v280_v57, %v279_v4  ;;  %v284_v8 = vsel %vm258_vm0, %v3080_v60, 0.0  ;;  %v3101_v13 = vld [vmem:[%s3002_s23 + $0x78] sm:$0xff] }
  0x2c   : > { %v907_v28 = vsel %vm902_vm3, %v904_v18, %v906_v19  ;;  %v1034_v29 = vsel %vm1031_vm4, %v1032_v20, %v1033_v21  ;;  %v1036_v33 = vsel %vm1031_vm4, %v1033_v21, %v1035_v23  ;;  %v1188_v34 = vsel %vm902_vm3, %v1185_v9, %v1187_v25  ;;  %v3109_v19 = vld [vmem:[%s3002_s23 + $0x80] sm:$0xff] }
  0x2d   : > { %v1015_v32 = vpack.c.bf16 %v907_v28, %v905_v27  ;;  %v1144_v36 = vpack.c.bf16 %v1036_v33, %v1034_v29  ;;  %v1191_v40 = vpack.c.bf16 %v1188_v34, %v1186_v24  ;;  %v332_v9 = vmul.f32 %v3025_v26, %v3025_v26  ;;  %v3117_v27 = vld [vmem:[%s3002_s23 + $0x88] sm:$0xff]  ;;  %v3125_v34 = vld [vmem:[%s3002_s23 + $0x90] sm:$0xff] }
  0x2e   : > { %v360_v10 = vsel %vm258_vm0, %v328_v62, 0.0  ;;  %v361_v11 = vsel %vm258_vm0, %v329_v63, 0.0  ;;  %v283_v14 = vadd.f32 %v282_v58, %v281_v7  ;;  %v286_v16 = vsel %vm258_vm0, %v3091_v6, 0.0 }
  0x2f   : > { %1216 = vrot.lane.b32.xlu0 %v1015_v32, %s2910_s25  ;;  %1264 = vrot.lane.b32.xlu1 %v1144_v36, %s2909_s24  ;;  %v362_v15 = vadd.f32 %v361_v11, %v360_v10  ;;  %v365_v18 = vsel %vm258_vm0, %v331_v5, 0.0  ;;  %v288_v23 = vsel %vm258_vm0, %v3101_v13, 0.0  ;;  %v334_v24 = vmul.f32 %v3038_v37, %v3038_v37  ;;  %v3157_v5 = vld [vmem:[%s3002_s23 + $0xb0] sm:$0xff] }
  0x30   : > { %v285_v20 = vadd.f32 %v284_v8, %v283_v14  ;;  %v367_v25 = vsel %vm258_vm0, %v332_v9, 0.0  ;;  %v290_v31 = vsel %vm258_vm0, %v3109_v19, 0.0  ;;  %v335_v32 = vmul.f32 %v3047_v42, %v3047_v42 }
  0x31   : > { %v364_v21 = vadd.f32 %v363_v12, %v362_v15  ;;  %v369_v33 = vsel %vm258_vm0, %v333_v17, 0.0  ;;  %v292_v38 = vsel %vm258_vm0, %v3117_v27, 0.0  ;;  %v294_v46 = vsel %vm258_vm0, %v3125_v34, 0.0  ;;  %v3165_v12 = vld [vmem:[%s3002_s23 + $0xb8] sm:$0xff] }
  0x32   : > { %v287_v28 = vadd.f32 %v286_v16, %v285_v20  ;;  %v373_v52 = vsel %vm258_vm0, %v335_v32, 0.0  ;;  %v296_v56 = vsel %vm258_vm0, %v3133_v41, 0.0  ;;  %v338_v57 = vmul.f32 %v3059_v48, %v3059_v48  ;;  %v3173_v20 = vld [vmem:[%s3002_s23 + $0xc0] sm:$0xff] }
  0x33   : > { %1442 = vrot.lane.b32.xlu0 %v1191_v40, %s2911_s26  ;;  %v366_v29 = vadd.f32 %v365_v18, %v364_v21  ;;  %v371_v40 = vsel %vm258_vm0, %v334_v24, 0.0  ;;  %v375_v58 = vsel %vm258_vm0, %v336_v39, 0.0  ;;  %v298_v63 = vsel %vm258_vm0, %v3141_v53, 0.0 }
  0x34   : > { %v289_v35 = vadd.f32 %v288_v23, %v287_v28  ;;  %v377_v4 = vsel %vm258_vm0, %v337_v49, 0.0  ;;  %v300_v9 = vsel %vm258_vm0, %v3149_v59, 0.0  ;;  %v340_v10 = vmul.f32 %v3067_v51, %v3067_v51  ;;  %v3197_v49 = vld [vmem:[%s3002_s23 + $0xd8] sm:$0xff] }
  0x35   : > { %v368_v36 = vadd.f32 %v367_v25, %v366_v29  ;;  %v379_v11 = vsel %vm258_vm0, %v338_v57, 0.0  ;;  %v302_v16 = vsel %vm258_vm0, %v3157_v5, 0.0  ;;  %v341_v17 = vmul.f32 %v3080_v60, %v3080_v60  ;;  %v3181_v29 = vld [vmem:[%s3002_s23 + $0xc8] sm:$0xff] }
  0x36   : > { %v291_v43 = vadd.f32 %v290_v31, %v289_v35  ;;  %v381_v18 = vsel %vm258_vm0, %v339_v0, 0.0  ;;  %v304_v24 = vsel %vm258_vm0, %v3165_v12, 0.0  ;;  %v342_v25 = vmul.f32 %v3091_v6, %v3091_v6 }
  0x37   : > { %v370_v44 = vadd.f32 %v369_v33, %v368_v36  ;;  %v383_v28 = vsel %vm258_vm0, %v340_v10, 0.0  ;;  %v306_v33 = vsel %vm258_vm0, %v3173_v20, 0.0  ;;  %v343_v35 = vmul.f32 %v3101_v13, %v3101_v13 }
  0x38   : > { %v293_v54 = vadd.f32 %v292_v38, %v291_v43  ;;  %v385_v36 = vsel %vm258_vm0, %v341_v17, 0.0  ;;  %v3189_v38 = vld [vmem:[%s3002_s23 + $0xd0] sm:$0xff]  ;;  %v308_v43 = vsel %vm258_vm0, %v3181_v29, 0.0  ;;  %v346_v0 = vmul.f32 %v3125_v34, %v3125_v34 }
  0x39   : > { %v372_v55 = vadd.f32 %v371_v40, %v370_v44  ;;  %v344_v44 = vmul.f32 %v3109_v19, %v3109_v19  ;;  %v389_v57 = vsel %vm258_vm0, %v343_v35, 0.0 }
  0x3a   : > { %v295_v61 = vadd.f32 %v294_v46, %v293_v54  ;;  %v387_v46 = vsel %vm258_vm0, %v342_v25, 0.0 }
  0x3b   : > { %v374_v62 = vadd.f32 %v373_v52, %v372_v55  ;;  %v310_v55 = vsel %vm258_vm0, %v3189_v38, 0.0 }
  0x3c   : > { %v297_v7 = vadd.f32 %v296_v56, %v295_v61  ;;  %v345_v56 = vmul.f32 %v3117_v27, %v3117_v27 }
  0x3d   : > { %v376_v8 = vadd.f32 %v375_v58, %v374_v62  ;;  %v3205_v58 = vld [vmem:[%s3002_s23 + $0xe0] sm:$0xff] }
  0x3e   : > { %v299_v14 = vadd.f32 %v298_v63, %v297_v7  ;;  %v312_v63 = vsel %vm258_vm0, %v3197_v49, 0.0  ;;  %v3213_v7 = vld [vmem:[%s3002_s23 + $0xe8] sm:$0xff]  ;;  %v314_v10 = vsel %vm258_vm0, %v3205_v58, 0.0 }
  0x3f   : > { %v378_v15 = vadd.f32 %v377_v4, %v376_v8  ;;  %v391_v4 = vsel %vm258_vm0, %v344_v44, 0.0 }
  0x40   : > { %v301_v21 = vadd.f32 %v300_v9, %v299_v14  ;;  %v393_v14 = vsel %vm258_vm0, %v345_v56, 0.0 }
  0x41   : > { %v380_v23 = vadd.f32 %v379_v11, %v378_v15  ;;  %v347_v11 = vmul.f32 %v3133_v41, %v3133_v41  ;;  %v3221_v15 = vld [vmem:[%s3002_s23 + $0xf0] sm:$0xff] }
  0x42   : > { %v303_v31 = vadd.f32 %v302_v16, %v301_v21  ;;  %v348_v21 = vmul.f32 %v3141_v53, %v3141_v53 }
  0x43   : > { %v382_v32 = vadd.f32 %v381_v18, %v380_v23  ;;  %v316_v18 = vsel %vm258_vm0, %v3213_v7, 0.0  ;;  %v395_v23 = vsel %vm258_vm0, %v346_v0, 0.0  ;;  %v354_v0 = vmul.f32 %v3189_v38, %v3189_v38 }
  0x44   : > { %v305_v39 = vadd.f32 %v304_v24, %v303_v31  ;;  %v349_v31 = vmul.f32 %v3149_v59, %v3149_v59  ;;  %v399_v53 = vsel %vm258_vm0, %v348_v21, 0.0 }
  0x45   : > { %v384_v40 = vadd.f32 %v383_v28, %v382_v32  ;;  %v318_v28 = vsel %vm258_vm0, %v3221_v15, 0.0  ;;  %v397_v32 = vsel %vm258_vm0, %v347_v11, 0.0 }
  0x46   : > { %v307_v52 = vadd.f32 %v306_v33, %v305_v39  ;;  %v3234_v33 = vld [vmem:[%s3002_s23 + $0xf8] sm:$0xff]  ;;  %v350_v39 = vmul.f32 %v3157_v5, %v3157_v5  ;;  %v401_v59 = vsel %vm258_vm0, %v349_v31, 0.0 }
  0x47   : > { %v386_v54 = vadd.f32 %v385_v36, %v384_v40  ;;  %v320_v44 = vsel %vm258_vm0, %v3234_v33, 0.0 }
  0x48   : > { %v309_v61 = vadd.f32 %v308_v43, %v307_v52 }
  0x49   : > { %v388_v62 = vadd.f32 %v387_v46, %v386_v54  ;;  %v351_v46 = vmul.f32 %v3165_v12, %v3165_v12  ;;  %v352_v54 = vmul.f32 %v3173_v20, %v3173_v20 }
  0x4a   : > { %v311_v8 = vadd.f32 %v310_v55, %v309_v61  ;;  %v403_v55 = vsel %vm258_vm0, %v350_v39, 0.0  ;;  %v353_v61 = vmul.f32 %v3181_v29, %v3181_v29 }
  0x4b   : > { %v390_v9 = vadd.f32 %v389_v57, %v388_v62  ;;  %v405_v62 = vsel %vm258_vm0, %v351_v46, 0.0 }
  0x4c   : > { %v313_v16 = vadd.f32 %v312_v63, %v311_v8  ;;  %v409_v11 = vsel %vm258_vm0, %v353_v61, 0.0 }
  0x4d   : > { %v392_v17 = vadd.f32 %v391_v4, %v390_v9  ;;  %v407_v4 = vsel %vm258_vm0, %v352_v54, 0.0 }
  0x4e   : > { %v315_v24 = vadd.f32 %v314_v10, %v313_v16  ;;  %v355_v10 = vmul.f32 %v3197_v49, %v3197_v49  ;;  %v356_v16 = vmul.f32 %v3205_v58, %v3205_v58 }
  0x4f   : > { %v394_v25 = vadd.f32 %v393_v14, %v392_v17  ;;  %v411_v17 = vsel %vm258_vm0, %v354_v0, 0.0 }
  0x50   : > { %v317_v35 = vadd.f32 %v316_v18, %v315_v24  ;;  %v413_v24 = vsel %vm258_vm0, %v355_v10, 0.0  ;;  %v415_v31 = vsel %vm258_vm0, %v356_v16, 0.0 }
  0x51   : > { %v396_v36 = vadd.f32 %v395_v23, %v394_v25  ;;  %v357_v23 = vmul.f32 %v3213_v7, %v3213_v7 }
  0x52   : > { %v319_v40 = vadd.f32 %v318_v28, %v317_v35  ;;  %v358_v28 = vmul.f32 %v3221_v15, %v3221_v15 }
  0x53   : > { %v398_v43 = vadd.f32 %v397_v32, %v396_v36  ;;  %v359_v36 = vmul.f32 %v3234_v33, %v3234_v33  ;;  %v417_v39 = vsel %vm258_vm0, %v357_v23, 0.0 }
  0x54   : > { %v321_v56 = vadd.f32 %v320_v44, %v319_v40  ;;  %v419_v40 = vsel %vm258_vm0, %v358_v28, 0.0 }
  0x55   : > { %v400_v52 = vadd.f32 %v399_v53, %v398_v43  ;;  %v421_v46 = vsel %vm258_vm0, %v359_v36, 0.0 }
  0x56   : > { %v322_v8 = vrot.slane %v321_v56, 4 }
  0x57   : > { %v402_v57 = vadd.f32 %v401_v59, %v400_v52 }
  0x58   : > { %v323_v18 = vadd.f32 %v322_v8, %v321_v56 }
  0x59   : > { %v404_v63 = vadd.f32 %v403_v55, %v402_v57 }
  0x5a   : > { %v324_v32 = vrot.slane %v323_v18, 2 }
  0x5b   : > { %v406_v9 = vadd.f32 %v405_v62, %v404_v63 }
  0x5c   : > { %v325_v43 = vadd.f32 %v324_v32, %v323_v18 }
  0x5d   : > { %v408_v14 = vadd.f32 %v407_v4, %v406_v9 }
  0x5e   : > { %v326_v52 = vrot.slane %v325_v43, 1 }
  0x5f   : > { %v410_v21 = vadd.f32 %v409_v11, %v408_v14  ;;  %v440_v14 = vlaneseq }
  0x60   : > { %v327_v56 = vadd.f32 %v326_v52, %v325_v43 }
  0x61   : > { %v412_v25 = vadd.f32 %v411_v17, %v410_v21  ;;  %v441_v16 = vshrl.u32 %v440_v14, 7  ;;  %v435_v17 = vld [vmem:[%s4655_s1] sm:$0x1] }
  0x62   : > { %v429_v63 = vmul.f32 0.00390625, %v327_v56 }
  0x63   : > { %v414_v35 = vadd.f32 %v413_v24, %v412_v25  ;;  %v442_v18 = vsub.s32 0, %v441_v16  ;;  %v437_v24 = vld [vmem:[%s4656_s2] sm:$0x1] }
  0x64   : > { %v431_v8 = vmul.f32 %v429_v63, %v429_v63 }
  0x65   : > { %v416_v53 = vadd.f32 %v415_v31, %v414_v35 }
  0x67   : > { %v418_v44 = vadd.f32 %v417_v39, %v416_v53 }
  0x69   : > { %v420_v59 = vadd.f32 %v419_v40, %v418_v44 }
  0x6b   : > { %v422_v54 = vadd.f32 %v421_v46, %v420_v59 }
  0x6d   : > { %v423_v55 = vrot.slane %v422_v54, 4 }
  0x6f   : > { %v424_v57 = vadd.f32 %v423_v55, %v422_v54 }
  0x71   : > { %v425_v61 = vrot.slane %v424_v57, 2 }
  0x73   : > { %v426_v62 = vadd.f32 %v425_v61, %v424_v57 }
  0x75   : > { %v427_v0 = vrot.slane %v426_v62, 1 }
  0x77   : > { %v428_v4 = vadd.f32 %v427_v0, %v426_v62 }
  0x79   : > { %v430_v9 = vmul.f32 0.00390625, %v428_v4 }
  0x7b   : > { %v432_v10 = vsub.f32 %v430_v9, %v431_v8 }
  0x7d   : > { %v433_v11 = vadd.f32 1e-05, %v432_v10 }
  0x7f   : > { %2763 = vrsqrt.f32 %v433_v11 }
  0x89   : > { %v2764_v21 = vpop.eup %2763 }
  0x8a   : > { %v436_v23 = vmul.f32 %v2764_v21, %v435_v17 }
  0x8c   : > { %v438_v25 = vmul.f32 %v436_v23, %v429_v63  ;;  %v3276_v28 = vrot.slane %v436_v23, %v442_v18 }
  0x8e   : > { %v439_v31 = vsub.f32 %v437_v24, %v438_v25  ;;  %v470_v32 = vmul.f32 %v3276_v28, %v3189_v38  ;;  %v471_v35 = vmul.f32 %v3276_v28, %v3197_v49  ;;  %v446_v36 = vmul.f32 %v3276_v28, %v3011_v3 }
  0x8f   : > { %v447_v39 = vmul.f32 %v3276_v28, %v3020_v22  ;;  %v448_v53 = vmul.f32 %v3276_v28, %v3025_v26  ;;  %v449_v40 = vmul.f32 %v3276_v28, %v3031_v30  ;;  %v444_v43 = vmul.f32 %v3276_v28, %v3005_v1 }
  0x90   : > { %v3292_v44 = vrot.slane %v439_v31, %v442_v18  ;;  %v445_v38 = vmul.f32 %v3276_v28, %v3008_v2  ;;  %v472_v3 = vmul.f32 %v3276_v28, %v3205_v58  ;;  %v473_v22 = vmul.f32 %v3276_v28, %v3213_v7 }
  0x91   : > { %v468_v26 = vmul.f32 %v3276_v28, %v3173_v20  ;;  %v469_v30 = vmul.f32 %v3276_v28, %v3181_v29  ;;  %v450_v62 = vmul.f32 %v3276_v28, %v3038_v37  ;;  %v451_v14 = vmul.f32 %v3276_v28, %v3047_v42 }
  0x92   : > { %v3305_v49 = vadd.f32 %v3292_v44, %v470_v32  ;;  %v3308_v1 = vadd.f32 %v3292_v44, %v471_v35  ;;  %v3311_v2 = vadd.f32 %v3292_v44, %v446_v36  ;;  %v3314_v58 = vadd.f32 %v3292_v44, %v447_v39 }
  0x93   : > { %v3317_v7 = vadd.f32 %v3292_v44, %v448_v53  ;;  %v3320_v20 = vadd.f32 %v3292_v44, %v449_v40  ;;  %v3323_v29 = vadd.f32 %v3292_v44, %v444_v43  ;;  %v3326_v46 = vadd.f32 %v3292_v44, %v445_v38 }
  0x94   : > { %v540_v59 = vsub.f32 0.0, %v3305_v49  ;;  %v541_v52 = vsub.f32 0.0, %v3308_v1  ;;  %v516_v54 = vsub.f32 0.0, %v3311_v2  ;;  %v517_v55 = vsub.f32 0.0, %v3314_v58 }
  0x95   : > { %v518_v56 = vsub.f32 0.0, %v3317_v7  ;;  %v519_v57 = vsub.f32 0.0, %v3320_v20  ;;  %v514_v61 = vsub.f32 0.0, %v3323_v29  ;;  %v3338_v8 = vadd.f32 %v3292_v44, %v472_v3 }
  0x96   : > { %v598_v63 = vmul.f32 1.442695, %v540_v59  ;;  %v600_v0 = vmul.f32 1.442695, %v541_v52  ;;  %v550_v4 = vmul.f32 1.442695, %v516_v54  ;;  %v3342_v11 = vadd.f32 %v3292_v44, %v473_v22 }
  0x97   : > { %v552_v9 = vmul.f32 1.442695, %v517_v55  ;;  %v515_v10 = vsub.f32 0.0, %v3326_v46  ;;  %v554_v16 = vmul.f32 1.442695, %v518_v56  ;;  %v542_v37 = vsub.f32 0.0, %v3338_v8 }
  0x98   : > { %2765 = vpow2.f32 %v598_v63  ;;  %v556_v17 = vmul.f32 1.442695, %v519_v57  ;;  %v543_v18 = vsub.f32 0.0, %v3342_v11  ;;  %v3349_v21 = vadd.f32 %v3292_v44, %v468_v26 }
  0x99   : > { %2767 = vpow2.f32 %v600_v0  ;;  %v3352_v23 = vadd.f32 %v3292_v44, %v469_v30  ;;  %v546_v24 = vmul.f32 1.442695, %v514_v61  ;;  %v3355_v25 = vadd.f32 %v3292_v44, %v450_v62 }
  0x9a   : > { %2769 = vpow2.f32 %v550_v4  ;;  %v548_v42 = vmul.f32 1.442695, %v515_v10  ;;  %v538_v31 = vsub.f32 0.0, %v3349_v21  ;;  %v602_v35 = vmul.f32 1.442695, %v542_v37 }
  0x9b   : > { %2771 = vpow2.f32 %v552_v9  ;;  %v539_v32 = vsub.f32 0.0, %v3352_v23  ;;  %v520_v36 = vsub.f32 0.0, %v3355_v25  ;;  %v474_v39 = vmul.f32 %v3276_v28, %v3221_v15 }
  0x9c   : > { %2773 = vpow2.f32 %v554_v16  ;;  %v604_v53 = vmul.f32 1.442695, %v543_v18  ;;  %v3363_v40 = vadd.f32 %v3292_v44, %v451_v14  ;;  %v475_v43 = vmul.f32 %v3276_v28, %v3234_v33 }
  0x9d   : > { %2775 = vpow2.f32 %v556_v17  ;;  %v594_v38 = vmul.f32 1.442695, %v538_v31  ;;  %v3368_v3 = vadd.f32 %v3292_v44, %v474_v39  ;;  %v596_v22 = vmul.f32 1.442695, %v539_v32 }
  0x9e   : > { %2777 = vpow2.f32 %v546_v24  ;;  %v3371_v26 = vadd.f32 %v3292_v44, %v475_v43  ;;  %v452_v15 = vmul.f32 %v3276_v28, %v3052_v45  ;;  %v558_v30 = vmul.f32 1.442695, %v520_v36 }
  0x9f   : > { %2779 = vpow2.f32 %v548_v42  ;;  %v453_v59 = vmul.f32 %v3276_v28, %v3056_v47  ;;  %v454_v33 = vmul.f32 %v3276_v28, %v3059_v48  ;;  %v521_v52 = vsub.f32 0.0, %v3363_v40 }
  0xa0   : > { %2781 = vpow2.f32 %v602_v35  ;;  %v455_v54 = vmul.f32 %v3276_v28, %v3064_v50  ;;  %v544_v56 = vsub.f32 0.0, %v3368_v3  ;;  %v545_v45 = vsub.f32 0.0, %v3371_v26 }
  0xa1   : > { %2783 = vpow2.f32 %v604_v53  ;;  %v3385_v47 = vadd.f32 %v3292_v44, %v452_v15  ;;  %v3388_v63 = vadd.f32 %v3292_v44, %v453_v59  ;;  %v3391_v50 = vadd.f32 %v3292_v44, %v454_v33 }
  0xa2   : > { %v2766_v55 = vpop.eup %2765  ;;  %2785 = vpow2.f32 %v594_v38  ;;  %v560_v9 = vmul.f32 1.442695, %v521_v52  ;;  %v3394_v10 = vadd.f32 %v3292_v44, %v455_v54  ;;  %v3396_v17 = vmul.f32 1.442695, %v544_v56 }
  0xa3   : > { %v2768_v57 = vpop.eup %2767  ;;  %v636_v61 = vadd.f32 1.0, %v2766_v55  ;;  %2787 = vpow2.f32 %v596_v22  ;;  %v3398_v37 = vmul.f32 1.442695, %v545_v45  ;;  %v522_v42 = vsub.f32 0.0, %v3385_v47 }
  0xa4   : > { %v2770_v62 = vpop.eup %2769  ;;  %v637_v48 = vadd.f32 1.0, %v2768_v57  ;;  %2789 = vpow2.f32 %v558_v30  ;;  %v456_v31 = vmul.f32 %v3276_v28, %v3067_v51  ;;  %v523_v36 = vsub.f32 0.0, %v3388_v63 }
  0xa5   : > { %v2772_v0 = vpop.eup %2771  ;;  %2791 = vrcp.f32 %v636_v61  ;;  %v612_v4 = vadd.f32 1.0, %v2770_v62  ;;  %v524_v39 = vsub.f32 0.0, %v3391_v50  ;;  %v525_v38 = vsub.f32 0.0, %v3394_v10 }
  0xa6   : > { %v2774_v14 = vpop.eup %2773  ;;  %2793 = vrcp.f32 %v637_v48  ;;  %v613_v16 = vadd.f32 1.0, %v2772_v0  ;;  %v457_v22 = vmul.f32 %v3276_v28, %v3080_v60  ;;  %v3409_v51 = vadd.f32 %v3292_v44, %v456_v31 }
  0xa7   : > { %v2776_v18 = vpop.eup %2775  ;;  %2795 = vrcp.f32 %v612_v4  ;;  %v614_v24 = vadd.f32 1.0, %v2774_v14  ;;  %v458_v59 = vmul.f32 %v3276_v28, %v3091_v6  ;;  %v562_v54 = vmul.f32 1.442695, %v522_v42 }
  0xa8   : > { %v2778_v32 = vpop.eup %2777  ;;  %2797 = vrcp.f32 %v613_v16  ;;  %v615_v35 = vadd.f32 1.0, %v2776_v18  ;;  %v459_v55 = vmul.f32 %v3276_v28, %v3101_v13  ;;  %v564_v60 = vmul.f32 1.442695, %v523_v36 }
  0xa9   : > { %v2780_v53 = vpop.eup %2779  ;;  %2799 = vrcp.f32 %v614_v24  ;;  %v610_v43 = vadd.f32 1.0, %v2778_v32  ;;  %v566_v57 = vmul.f32 1.442695, %v524_v39  ;;  %v568_v48 = vmul.f32 1.442695, %v525_v38 }
  0xaa   : > { %v2782_v15 = vpop.eup %2781  ;;  %2801 = vrcp.f32 %v615_v35  ;;  %v611_v30 = vadd.f32 1.0, %v2780_v53  ;;  %v3416_v0 = vadd.f32 %v3292_v44, %v457_v22  ;;  %v526_v14 = vsub.f32 0.0, %v3409_v51 }
  0xab   : > { %v2784_v33 = vpop.eup %2783  ;;  %2803 = vrcp.f32 %v610_v43  ;;  %v638_v52 = vadd.f32 1.0, %v2782_v15  ;;  %v3420_v16 = vadd.f32 %v3292_v44, %v458_v59  ;;  %v3423_v24 = vadd.f32 %v3292_v44, %v459_v55 }
  0xac   : > { %v2786_v56 = vpop.eup %2785  ;;  %2805 = vrcp.f32 %v611_v30  ;;  %v639_v45 = vadd.f32 1.0, %v2784_v33  ;;  %v460_v42 = vmul.f32 %v3276_v28, %v3109_v19  ;;  %v461_v35 = vmul.f32 %v3276_v28, %v3117_v27 }
  0xad   : > { %v2788_v61 = vpop.eup %2787  ;;  %2807 = vrcp.f32 %v638_v52  ;;  %v634_v62 = vadd.f32 1.0, %v2786_v56  ;;  %v462_v36 = vmul.f32 %v3276_v28, %v3125_v34  ;;  %v527_v43 = vsub.f32 0.0, %v3416_v0 }
  0xae   : > { %v2790_v6 = vpop.eup %2789  ;;  %2809 = vrcp.f32 %v639_v45  ;;  %v635_v4 = vadd.f32 1.0, %v2788_v61  ;;  %v463_v38 = vmul.f32 %v3276_v28, %v3133_v41  ;;  %v3439_v27 = vadd.f32 %v3292_v44, %v460_v42 }
  0xaf   : > { %v2792_v13 = vpop.eup %2791  ;;  %2811 = vrcp.f32 %v634_v62  ;;  %v616_v18 = vadd.f32 1.0, %v2790_v6  ;;  %v3442_v34 = vadd.f32 %v3292_v44, %v461_v35  ;;  %v3448_v41 = vadd.f32 %v3292_v44, %v462_v36 }
  0xb0   : > { %v2794_v31 = vpop.eup %2793  ;;  %v700_v32 = vmul.f32 %v2792_v13, %v3305_v49  ;;  %2813 = vrcp.f32 %v635_v4  ;;  %v570_v30 = vmul.f32 1.442695, %v526_v14  ;;  %v528_v59 = vsub.f32 0.0, %v3420_v16 }
  0xb1   : > { %v2796_v39 = vpop.eup %2795  ;;  %v701_v53 = vmul.f32 %v2794_v31, %v3308_v1  ;;  %2815 = vpow2.f32 %v560_v9  ;;  %v3451_v9 = vadd.f32 %v3292_v44, %v463_v38  ;;  %v529_v52 = vsub.f32 0.0, %v3423_v24 }
  0xb2   : > { %v2798_v19 = vpop.eup %2797  ;;  %778 = vst.msk [vmem:[#allocation2 + $0x151] sm:$0xff] %vm258_vm0, %v700_v32  ;;  %v676_v49 = vmul.f32 %v2796_v39, %v3311_v2  ;;  %2817 = vrcp.f32 %v616_v18  ;;  %v466_v6 = vmul.f32 %v3276_v28, %v3157_v5 }
  0xb3   : > { %v2800_v22 = vpop.eup %2799  ;;  %779 = vst.msk [vmem:[#allocation2 + $0x159] sm:$0xff] %vm258_vm0, %v701_v53  ;;  %v677_v1 = vmul.f32 %v2798_v19, %v3314_v58  ;;  %2819 = vpow2.f32 %v3396_v17  ;;  %v572_v17 = vmul.f32 1.442695, %v527_v43  ;;  %v3503_v43 = vmul.f32 %v3276_v28, %v3165_v12 }
  0xb4   : > { %v2802_v2 = vpop.eup %2801  ;;  %754 = vst.msk [vmem:[#allocation2 + $0x31] sm:$0xff] %vm258_vm0, %v676_v49  ;;  %v678_v15 = vmul.f32 %v2800_v22, %v3317_v7  ;;  %2821 = vpow2.f32 %v3398_v37  ;;  %v530_v7 = vsub.f32 0.0, %v3439_v27  ;;  %v531_v37 = vsub.f32 0.0, %v3442_v34 }
  0xb5   : > { %v2804_v33 = vpop.eup %2803  ;;  %755 = vst.msk [vmem:[#allocation2 + $0x39] sm:$0xff] %vm258_vm0, %v677_v1  ;;  %v679_v58 = vmul.f32 %v2802_v2, %v3320_v20  ;;  %2823 = vpow2.f32 %v562_v54  ;;  %v532_v20 = vsub.f32 0.0, %v3448_v41  ;;  %v533_v54 = vsub.f32 0.0, %v3451_v9 }
  0xb6   : > { %v2806_v55 = vpop.eup %2805  ;;  %756 = vst.msk [vmem:[#allocation2 + $0x49] sm:$0xff] %vm258_vm0, %v678_v15  ;;  %v674_v56 = vmul.f32 %v2804_v33, %v3323_v29  ;;  %2825 = vpow2.f32 %v564_v60  ;;  %v574_v60 = vmul.f32 1.442695, %v528_v59  ;;  %v3484_v5 = vmul.f32 1.442695, %v531_v37 }
  0xb7   : > { %v2808_v45 = vpop.eup %2807  ;;  %757 = vst.msk [vmem:[#allocation2 + $0x51] sm:$0xff] %vm258_vm0, %v679_v58  ;;  %v675_v61 = vmul.f32 %v2806_v55, %v3326_v46  ;;  %2827 = vpow2.f32 %v566_v57  ;;  %v3476_v57 = vmul.f32 1.442695, %v529_v52  ;;  %v3494_v35 = vmul.f32 1.442695, %v532_v20 }
  0xb8   : > { %v2810_v62 = vpop.eup %2809  ;;  %752 = vst.msk [vmem:[#allocation2 + $0x19] sm:$0xff] %vm258_vm0, %v674_v56  ;;  %v702_v29 = vmul.f32 %v2808_v45, %v3338_v8  ;;  %2829 = vpow2.f32 %v568_v48  ;;  %v3482_v48 = vmul.f32 1.442695, %v530_v7  ;;  %v3496_v36 = vmul.f32 1.442695, %v533_v54 }
  0xb9   : > { %v2812_v4 = vpop.eup %2811  ;;  %v3472_v14 = vld [vmem:[#allocation2 + $0x150] sm:$0xff]  ;;  %753 = vst.msk [vmem:[#allocation2 + $0x21] sm:$0xff] %vm258_vm0, %v675_v61  ;;  %v703_v46 = vmul.f32 %v2810_v62, %v3342_v11  ;;  %2831 = vpow2.f32 %v570_v30  ;;  %v3506_v38 = vadd.f32 %v3292_v44, %v466_v6 }
  0xba   : > { %v2814_v13 = vpop.eup %2813  ;;  %v3478_v18 = vld [vmem:[#allocation2 + $0x158] sm:$0xff]  ;;  %780 = vst.msk [vmem:[#allocation2 + $0x169] sm:$0xff] %vm258_vm0, %v702_v29  ;;  %v698_v8 = vmul.f32 %v2812_v4, %v3349_v21  ;;  %2833 = vpow2.f32 %v572_v17 }
  0xbb   : > { %v2816_v42 = vpop.eup %2815  ;;  %v3488_v31 = vpack.c.bf16 %v3478_v18, %v3472_v14  ;;  %v3490_v11 = vld [vmem:[#allocation2 + $0x30] sm:$0xff]  ;;  %781 = vst.msk [vmem:[#allocation2 + $0x171] sm:$0xff] %vm258_vm0, %v703_v46  ;;  %v699_v32 = vmul.f32 %v2814_v13, %v3352_v23  ;;  %2835 = vpow2.f32 %v574_v60  ;;  %v973_v23 = vrot.slane %v3472_v14, 1  ;;  %v3595_v46 = vld [vmem:[#allocation2 + $0x160] sm:$0x3] }
  0xbc   : > { %v2818_v21 = vpop.eup %2817  ;;  %v3498_v39 = vld [vmem:[#allocation2 + $0x38] sm:$0xff]  ;;  %776 = vst.msk [vmem:[#allocation2 + $0x139] sm:$0xff] %vm258_vm0, %v698_v8  ;;  %v617_v53 = vadd.f32 1.0, %v2816_v42  ;;  %v974_v15 = vrot.slane %v3478_v18, 1  ;;  %v913_v17 = vrot.slane %v3490_v11, 1  ;;  %v1042_v52 = vrot.slane %v3490_v11, 2 }
  0xbd   : > { %4682 = vst [vmem:[#allocation3_spill] sm:$0xff] %v3488_v31  ;;  %v2820_v19 = vpop.eup %2819  ;;  %1402 = vrot.lane.b32.xlu0 %v3488_v31, %s2909_s24  ;;  %v3514_v22 = vpack.c.bf16 %v3498_v39, %v3490_v11  ;;  %v3516_v1 = vld [vmem:[#allocation2 + $0x48] sm:$0xff]  ;;  %777 = vst.msk [vmem:[#allocation2 + $0x141] sm:$0xff] %vm258_vm0, %v699_v32  ;;  %v680_v12 = vmul.f32 %v2818_v21, %v3355_v25  ;;  %v914_v37 = vrot.slane %v3498_v39, 1  ;;  %v1043_v45 = vrot.slane %v3498_v39, 2 }
  0xbe   : > { %v2822_v2 = vpop.eup %2821  ;;  %v3522_v59 = vld [vmem:[#allocation2 + $0x50] sm:$0xff]  ;;  %2837 = vrcp.f32 %v617_v53  ;;  %v640_v33 = vadd.f32 1.0, %v2820_v19 }
  0xbf   : > { %4683 = vst [vmem:[#allocation4_spill] sm:$0xff] %v3514_v22  ;;  %v2824_v58 = vpop.eup %2823  ;;  %1378 = vrot.lane.b32.xlu1 %v3514_v22, %s2909_s24  ;;  %v3530_v25 = vpack.c.bf16 %v3522_v59, %v3516_v1  ;;  %v3532_v55 = vld [vmem:[#allocation2 + $0x18] sm:$0xff]  ;;  %758 = vst.msk [vmem:[#allocation2 + $0x61] sm:$0xff] %vm258_vm0, %v680_v12  ;;  %v641_v56 = vadd.f32 1.0, %v2822_v2 }
  0xc0   : > { %v2826_v7 = vpop.eup %2825  ;;  %v3537_v61 = vld [vmem:[#allocation2 + $0x20] sm:$0xff]  ;;  %2839 = vrcp.f32 %v640_v33  ;;  %v618_v20 = vadd.f32 1.0, %v2824_v58  ;;  %v1037_v53 = vrot.slane %v3532_v55, 2  ;;  %v976_v58 = vrot.slane %v3595_v46, 1 }
  0xc1   : > { %4684 = vst [vmem:[#allocation5_spill] sm:$0xff] %v3530_v25  ;;  %v2828_v54 = vpop.eup %2827  ;;  %1380 = vrot.lane.b32.xlu0 %v3530_v25, %s2909_s24  ;;  %v3545_v60 = vpack.c.bf16 %v3537_v61, %v3532_v55  ;;  %v3547_v6 = vld [vmem:[#allocation2 + $0x168] sm:$0xff]  ;;  %2841 = vrcp.f32 %v641_v56  ;;  %v619_v42 = vadd.f32 1.0, %v2826_v7  ;;  %v1038_v56 = vrot.slane %v3537_v61, 2 }
  0xc2   : > { %v2830_v4 = vpop.eup %2829  ;;  %v3551_v8 = vld [vmem:[#allocation2 + $0x170] sm:$0xff]  ;;  %2843 = vrcp.f32 %v618_v20  ;;  %v620_v2 = vadd.f32 1.0, %v2828_v54 }
  0xc3   : > { %v2832_v32 = vpop.eup %2831  ;;  %1312 = vrot.lane.b32.xlu1 %v3545_v60, %s2911_s26  ;;  %v3559_v19 = vpack.c.bf16 %v3551_v8, %v3547_v6  ;;  %v3561_v12 = vld [vmem:[#allocation2 + $0x138] sm:$0xff]  ;;  %2845 = vrcp.f32 %v619_v42  ;;  %v621_v20 = vadd.f32 1.0, %v2830_v4  ;;  %v3576_v42 = vld [vmem:[#allocation2 + $0x28] sm:$0x3]  ;;  %v3590_v29 = vsel %vm1031_vm4, %v1037_v53, %v1038_v56 }
  0xc4   : > { %v2834_v33 = vpop.eup %2833  ;;  %v3565_v7 = vld [vmem:[#allocation2 + $0x140] sm:$0xff]  ;;  %2847 = vrcp.f32 %v620_v2  ;;  %v622_v49 = vadd.f32 1.0, %v2832_v32 }
  0xc5   : > { %4685 = vst [vmem:[#allocation6_spill] sm:$0xff] %v3559_v19  ;;  %1404 = vrot.lane.b32.xlu0 %v3559_v19, %s2909_s24  ;;  %v3573_v13 = vpack.c.bf16 %v3565_v7, %v3561_v12  ;;  %v2836_v54 = vpop.eup %2835  ;;  %2849 = vrcp.f32 %v621_v20  ;;  %v623_v30 = vadd.f32 1.0, %v2834_v33  ;;  %v1098_v32 = vrot.slane %v3565_v7, 2  ;;  %v792_v33 = vld [vmem:[#allocation2 + $0x40] sm:$0x3] }
  0xc6   : > { %2851 = vpow2.f32 %v3476_v57  ;;  %v624_v21 = vadd.f32 1.0, %v2836_v54  ;;  %v3587_v4 = vld [vmem:[#allocation2 + $0x60] sm:$0xff]  ;;  %v1040_v57 = vrot.slane %v3576_v42, 2  ;;  %v3593_v54 = vld [vmem:[#allocation2 + $0x148] sm:$0x3]  ;;  %v916_v53 = vrot.slane %v792_v33, 1 }
  0xc7   : > { %1336 = vrot.lane.b32.xlu1 %v3573_v13, %s2911_s26  ;;  %2853 = vrcp.f32 %v622_v49 }
  0xc8   : > { %v2838_v62 = vpop.eup %2837  ;;  %2855 = vrcp.f32 %v623_v30 }
  0xc9   : > { %v681_v20 = vmul.f32 %v2838_v62, %v3363_v40  ;;  %2857 = vrcp.f32 %v624_v21  ;;  %v975_v40 = vsel %vm902_vm3, %v973_v23, %v974_v15  ;;  %v915_v21 = vsel %vm902_vm3, %v913_v17, %v914_v37 }
  0xca   : > { %v2840_v2 = vpop.eup %2839  ;;  %2859 = vpow2.f32 %v3482_v48  ;;  %v1041_v48 = vsel %vm1031_vm4, %v1038_v56, %v1040_v57  ;;  %v3624_v17 = vadd.f32 %v3292_v44, %v3503_v43  ;;  %v2745_v57 = vld [vmem:[%s4657_s3 + $0x40] sm:$0xff]  }
  0xcb   : > { %v2842_v30 = vpop.eup %2841  ;;  %759 = vst.msk [vmem:[#allocation2 + $0x69] sm:$0xff] %vm258_vm0, %v681_v20  ;;  %1314 = vrot.lane.b32.xlu1 %v3514_v22, %s2911_s26  ;;  %v704_v62 = vmul.f32 %v2840_v2, %v3368_v3  ;;  %2861 = vpow2.f32 %v3484_v5  ;;  %v1100_v20 = vrot.slane %v3593_v54, 2  ;;  %v3626_v2 = vld [vmem:[#allocation2 + $0x58] sm:$0x3]  ;;  %v977_v5 = vsel %vm902_vm3, %v974_v15, %v976_v58  ;;  %2551 = vmatprep.subr.bf16.mxu0 %v2745_v57 }
  0xcc   : > { %v2844_v49 = vpop.eup %2843  ;;  %v705_v23 = vmul.f32 %v2842_v30, %v3371_v26  ;;  %2863 = vpow2.f32 %v3494_v35  ;;  %v1044_v35 = vsel %vm1031_vm4, %v1042_v52, %v1043_v45  ;;  %v537_v15 = vsub.f32 0.0, %v3624_v17  ;;  %2717 = vmatprep.subr.bf16.mxu1 %v2745_v57  ;;  %v2747_v57 = vld [vmem:[%s4657_s3 + $0x48] sm:$0xff]  }
  0xcd   : > { %782 = vst.msk [vmem:[#allocation2 + $0x181] sm:$0xff] %vm258_vm0, %v704_v62  ;;  %v682_v3 = vmul.f32 %v2844_v49, %v3385_v47  ;;  %v2846_v26 = vpop.eup %2845  ;;  %2865 = vpow2.f32 %v3496_v36  ;;  %v536_v47 = vsub.f32 0.0, %v3506_v38  ;;  %v3643_v36 = vpack.c.bf16 %v977_v5, %v975_v40 }
  0xce   : > { %783 = vst.msk [vmem:[#allocation2 + $0x189] sm:$0xff] %vm258_vm0, %v705_v23  ;;  %v2848_v43 = vpop.eup %2847  ;;  %v683_v56 = vmul.f32 %v2846_v26, %v3388_v63  ;;  %v1045_v58 = vrot.slane %v792_v33, 2  ;;  %v4686_v30 = vrot.slane %v3522_v59, 1  ;;  %v4687_v62 = vrot.slane %v3516_v1, 1  ;;  %v2746_v33 = vld [vmem:[%s4657_s3] sm:$0xff]  }
  0xcf   : > { %1338 = vrot.lane.b32.xlu1 %v3488_v31, %s2911_s26  ;;  %760 = vst.msk [vmem:[#allocation2 + $0x79] sm:$0xff] %vm258_vm0, %v682_v3  ;;  %v2850_v11 = vpop.eup %2849  ;;  %v684_v52 = vmul.f32 %v2848_v43, %v3391_v50  ;;  %v590_v49 = vmul.f32 1.442695, %v536_v47  ;;  %v921_v40 = vrot.slane %v3626_v2, 1  ;;  %v917_v50 = vsel %vm902_vm3, %v914_v37, %v916_v53  ;;  %2552 = vmatpush3.bf16.msra.mxu0 %v2746_v33 }
  0xd0   : > { %v920_v63 = vsel %vm902_vm3, %v4687_v62, %v4686_v30  ;;  %v2852_v23 = vpop.eup %2851  ;;  %761 = vst.msk [vmem:[#allocation2 + $0x81] sm:$0xff] %vm258_vm0, %v683_v56  ;;  %v685_v3 = vmul.f32 %v2850_v11, %v3394_v10  ;;  %v592_v26 = vmul.f32 1.442695, %v537_v15  ;;  %v1046_v5 = vsel %vm1031_vm4, %v1043_v45, %v1045_v58  ;;  %2725 = vmatpush3.bf16.msra.mxu1 %v2746_v33 }
  0xd1   : > { %v2854_v47 = vpop.eup %2853  ;;  %762 = vst.msk [vmem:[#allocation2 + $0x91] sm:$0xff] %vm258_vm0, %v684_v52  ;;  %v625_v30 = vadd.f32 1.0, %v2852_v23  ;;  %2867 = vpow2.f32 %v590_v49  ;;  %v3670_v56 = vpack.c.bf16 %v1046_v5, %v1044_v35  ;;  %v4688_v10 = vrot.slane %v3522_v59, 1  ;;  %2553 = vmatprep.subr.bf16.mxu0 %v2747_v57  ;;  %2718 = vmatprep.subr.bf16.mxu1 %v2747_v57 }
  0xd2   : > { %v3667_v43 = vld [vmem:[#allocation2 + $0x68] sm:$0xff]  ;;  %v2856_v39 = vpop.eup %2855  ;;  %763 = vst.msk [vmem:[#allocation2 + $0x99] sm:$0xff] %vm258_vm0, %v685_v3  ;;  %v686_v53 = vmul.f32 %v2854_v47, %v3409_v51  ;;  %v3684_v35 = vpack.c.bf16 %v1041_v48, %v3590_v29  ;;  %v4690_v15 = vrot.slane %v3561_v12, 2  ;;  %v3699_v51 = vpack.c.bf16 %v917_v50, %v915_v21 }
  0xd3   : > { %v922_v37 = vsel %vm902_vm3, %v4688_v10, %v921_v40  ;;  %v3677_v45 = vpack.c.bf16 %v3667_v43, %v3587_v4  ;;  %1316 = vrot.lane.b32.xlu1 %v3530_v25, %s2911_s26  ;;  %v2858_v11 = vpop.eup %2857  ;;  %v687_v49 = vmul.f32 %v2856_v39, %v3416_v0  ;;  %2869 = vrcp.f32 %v625_v30  ;;  %v2748_v48 = vld [vmem:[%s4657_s3 + $0x8] sm:$0xff]   ;;  %v2749_v10 = vld [vmem:[%s4657_s3 + $0x50] sm:$0xff]  }
  0xd4   : > { %v3691_v58 = vsel %vm1031_vm4, %v4690_v15, %v1098_v32  ;;  %v3696_v52 = vld [vmem:[#allocation2 + $0x180] sm:$0xff]  ;;  %v3701_v29 = vpack.c.bf16 %v922_v37, %v920_v63  ;;  %v2860_v62 = vpop.eup %2859  ;;  %764 = vst.msk [vmem:[#allocation2 + $0xa9] sm:$0xff] %vm258_vm0, %v686_v53  ;;  %v688_v0 = vmul.f32 %v2858_v11, %v3420_v16  ;;  %v3718_v21 = vsel %vm1031_vm4, %v1098_v32, %v1100_v20 }
  0xd5   : > { %4689 = vst [vmem:[#allocation7_spill] sm:$0xff] %v3677_v45  ;;  %1382 = vrot.lane.b32.xlu0 %v3677_v45, %s2909_s24  ;;  %v3709_v33 = vld [vmem:[#allocation2 + $0x188] sm:$0xff]  ;;  %2871 = vpow2.f32 %v592_v26  ;;  %v2862_v63 = vpop.eup %2861  ;;  %765 = vst.msk [vmem:[#allocation2 + $0xb1] sm:$0xff] %vm258_vm0, %v687_v49  ;;  %v626_v16 = vadd.f32 1.0, %v2860_v62  ;;  %2554 = vmatpush3.bf16.msra.mxu0 %v2748_v48  ;;  %v4691_v57 = vrot.slane %v3478_v18, 2  ;;  %v4692_v11 = vrot.slane %v3472_v14, 2 }
  0xd6   : > { %v3723_v3 = vpack.c.bf16 %v3709_v33, %v3696_v52  ;;  %v3725_v50 = vld [vmem:[#allocation2 + $0x78] sm:$0xff]  ;;  %v2864_v32 = vpop.eup %2863  ;;  %766 = vst.msk [vmem:[#allocation2 + $0xc1] sm:$0xff] %vm258_vm0, %v688_v0  ;;  %v627_v30 = vadd.f32 1.0, %v2862_v63  ;;  %2726 = vmatpush3.bf16.msra.mxu1 %v2748_v48  ;;  %v2750_v62 = vld [vmem:[%s4657_s3 + $0x10] sm:$0xff]   ;;  %2555 = vmatprep.subr.bf16.mxu0 %v2749_v10  ;;  %v1105_v0 = vrot.slane %v3595_v46, 2  ;;  %v4697_v39 = vrot.slane %v3565_v7, 1 }
  0xd7   : > { %1340 = vrot.lane.b32.xlu1 %v3559_v19, %s2911_s26  ;;  %v2866_v37 = vpop.eup %2865  ;;  %v3739_v53 = vld [vmem:[#allocation2 + $0x80] sm:$0xff]  ;;  %2873 = vrcp.f32 %v626_v16  ;;  %v628_v15 = vadd.f32 1.0, %v2864_v32  ;;  %v1104_v49 = vsel %vm1031_vm4, %v4692_v11, %v4691_v57  ;;  %v3759_v14 = vld [vmem:[#allocation2 + $0x178] sm:$0x3]  ;;  %2719 = vmatprep.subr.bf16.mxu1 %v2749_v10  ;;  %v4695_v10 = vrot.slane %v3551_v8, 1 }
  0xd8   : > { %v3753_v48 = vpack.c.bf16 %v3739_v53, %v3725_v50  ;;  %v3757_v16 = vld [vmem:[#allocation2 + $0x90] sm:$0xff]  ;;  %2875 = vrcp.f32 %v627_v30  ;;  %v2751_v32 = vld [vmem:[%s4657_s3 + $0x58] sm:$0xff]   ;;  %v629_v47 = vadd.f32 1.0, %v2866_v37  ;;  %v4696_v37 = vrot.slane %v3547_v6, 1 }
  0xd9   : > { %1406 = vrot.lane.b32.xlu0 %v3723_v3, %s2909_s24  ;;  %v3766_v5 = vld [vmem:[#allocation2 + $0x98] sm:$0xff]  ;;  %2877 = vrcp.f32 %v628_v15  ;;  %2556 = vmatpush3.bf16.msra.mxu0 %v2750_v62  ;;  %v981_v63 = vrot.slane %v3759_v14, 1  ;;  %v4698_v23 = vrot.slane %v3561_v12, 1  ;;  %v4699_v40 = vrot.slane %v3478_v18, 2  ;;  %v2753_v18 = vld [vmem:[%s4657_s3 + $0x60] sm:$0xff]  }
  0xda   : > { %4693 = vst [vmem:[#allocation8_spill] sm:$0xff] %v3753_v48  ;;  %v3770_v30 = vpack.c.bf16 %v3766_v5, %v3757_v16  ;;  %2557 = vmatprep.subr.bf16.mxu0 %v2751_v32  ;;  %2879 = vrcp.f32 %v629_v47  ;;  %v980_v15 = vsel %vm902_vm3, %v4696_v37, %v4695_v10  ;;  %v2752_v46 = vld [vmem:[%s4657_s3 + $0x18] sm:$0xff]   ;;  %2727 = vmatpush3.bf16.msra.mxu1 %v2750_v62  ;;  %v3810_v10 = vld [vmem:[#allocation2 + $0x70] sm:$0x3]  ;;  %v971_v62 = vrot.slane %v3593_v54, 1 }
  0xdb   : > { %1318 = vrot.lane.b32.xlu1 %v3677_v45, %s2911_s26  ;;  %v2868_v11 = vpop.eup %2867  ;;  %v3777_v57 = vld [vmem:[#allocation2 + $0xa8] sm:$0xff]  ;;  %v970_v20 = vsel %vm902_vm3, %v4698_v23, %v4697_v39  ;;  %v1106_v12 = vsel %vm1031_vm4, %v4699_v40, %v1105_v0  ;;  %2720 = vmatprep.subr.bf16.mxu1 %v2751_v32  ;;  %v4703_v19 = vrot.slane %v3522_v59, 2  ;;  %v4704_v25 = vrot.slane %v3516_v1, 2 }
  0xdc   : > { %4694 = vst [vmem:[#allocation9_spill] sm:$0xff] %v3770_v30  ;;  %v3797_v37 = vld [vmem:[#allocation2 + $0xb0] sm:$0xff]  ;;  %v632_v26 = vadd.f32 1.0, %v2868_v11  ;;  %v3808_v47 = vpack.c.bf16 %v1106_v12, %v1104_v49  ;;  %v4702_v12 = vrot.slane %v3551_v8, 1  ;;  %v1050_v54 = vrot.slane %v3626_v2, 2 }
  0xdd   : > { %1384 = vrot.lane.b32.xlu0 %v3753_v48, %s2909_s24  ;;  %v2870_v23 = vpop.eup %2869  ;;  %v3804_v39 = vpack.c.bf16 %v3797_v37, %v3777_v57  ;;  %2558 = vmatpush3.bf16.msra.mxu0 %v2752_v46  ;;  %v4663_v32 = vrot.slane %v3797_v37, 2  ;;  %v1049_v0 = vsel %vm1031_vm4, %v4704_v25, %v4703_v19  ;;  %v4706_v1 = vrot.slane %v3587_v4, 1 }
  0xde   : > { %4701 = vst [vmem:[#allocation11_spill] sm:$0xff] %v3808_v47  ;;  %v689_v11 = vmul.f32 %v2870_v23, %v3423_v24  ;;  %2881 = vrcp.f32 %v632_v26  ;;  %v982_v45 = vsel %vm902_vm3, %v4702_v12, %v981_v63  ;;  %2559 = vmatprep.subr.bf16.mxu0 %v2753_v18  ;;  %v2754_v24 = vld [vmem:[%s4657_s3 + $0x20] sm:$0xff]   ;;  %2728 = vmatpush3.bf16.msra.mxu1 %v2752_v46  ;;  %v4705_v26 = vrot.slane %v3667_v43, 1 }
  0xdf   : > { %4700 = vst [vmem:[#allocation10_spill] sm:$0xff] %v3804_v39  ;;  %v2872_v40 = vpop.eup %2871  ;;  %1342 = vrot.lane.b32.xlu1 %v3723_v3, %s2911_s26  ;;  %v3835_v3 = vpack.c.bf16 %v982_v45, %v980_v15  ;;  %v926_v19 = vrot.slane %v3810_v10, 1  ;;  %2721 = vmatprep.subr.bf16.mxu1 %v2753_v18  ;;  %v4707_v46 = vrot.slane %v3565_v7, 1  ;;  %v4708_v45 = vrot.slane %v3551_v8, 2  ;;  %v2755_v18 = vld [vmem:[%s4657_s3 + $0x68] sm:$0xff]  }
  0xe0   : > { %v633_v49 = vadd.f32 1.0, %v2872_v40  ;;  %767 = vst.msk [vmem:[#allocation2 + $0xc9] sm:$0xff] %vm258_vm0, %v689_v11  ;;  %v925_v25 = vsel %vm902_vm3, %v4706_v1, %v4705_v26  ;;  %v4709_v15 = vrot.slane %v3547_v6, 2  ;;  %v1110_v40 = vrot.slane %v3759_v14, 2  ;;  %v834_v11 = vld [vmem:[#allocation2 + $0x190] sm:$0x3] }
  0xe1   : > { %1386 = vrot.lane.b32.xlu0 %v3770_v30, %s2909_s24  ;;  %v2874_v63 = vpop.eup %2873  ;;  %v972_v23 = vsel %vm902_vm3, %v4707_v46, %v971_v62  ;;  %2560 = vmatpush3.bf16.msra.mxu0 %v2754_v24  ;;  %v4710_v6 = vrot.slane %v3522_v59, 2  ;;  %v4711_v14 = vmov %v4705_v26  ;;  %v3867_v1 = vld [vmem:[#allocation2 + $0x88] sm:$0x3] }
  0xe2   : > { %2883 = vrcp.f32 %v633_v49  ;;  %v1109_v2 = vsel %vm1031_vm4, %v4709_v15, %v4708_v45  ;;  %v2876_v12 = vpop.eup %2875  ;;  %v690_v49 = vmul.f32 %v2874_v63, %v3439_v27  ;;  %v3859_v7 = vpack.c.bf16 %v972_v23, %v970_v20  ;;  %2561 = vmatprep.subr.bf16.mxu0 %v2755_v18  ;;  %v2756_v59 = vld [vmem:[%s4657_s3 + $0x28] sm:$0xff]   ;;  %2729 = vmatpush3.bf16.msra.mxu1 %v2754_v24 }
  0xe3   : > { %1320 = vrot.lane.b32.xlu1 %v3753_v48, %s2911_s26  ;;  %v1051_v62 = vsel %vm1031_vm4, %v4710_v6, %v1050_v54  ;;  %v927_v26 = vsel %vm902_vm3, %v4711_v14, %v926_v19  ;;  %v2878_v46 = vpop.eup %2877  ;;  %v691_v45 = vmul.f32 %v2876_v12, %v3442_v34  ;;  %v4712_v20 = vrot.slane %v3551_v8, 2  ;;  %2722 = vmatprep.subr.bf16.mxu1 %v2755_v18 }
  0xe4   : > { %v3870_v15 = vpack.c.bf16 %v1051_v62, %v1049_v0  ;;  %v3872_v27 = vpack.c.bf16 %v927_v26, %v925_v25  ;;  %768 = vst.msk [vmem:[#allocation2 + $0xd9] sm:$0xff] %vm258_vm0, %v690_v49  ;;  %v692_v34 = vmul.f32 %v2878_v46, %v3448_v41  ;;  %v4714_v54 = vrot.slane %v3709_v33, 1  ;;  %v2880_v23 = vpop.eup %2879  ;;  %v2757_v26 = vld [vmem:[%s4657_s3 + $0x70] sm:$0xff]  }
  0xe5   : > { %v1111_v63 = vsel %vm1031_vm4, %v4712_v20, %v1110_v40  ;;  %1388 = vrot.lane.b32.xlu0 %v3804_v39, %s2909_s24  ;;  %v4715_v8 = vrot.slane %v3696_v52, 1  ;;  %v1167_v19 = vrot.slane %v834_v11, 1  ;;  %v3891_v40 = vld [vmem:[#allocation2 + $0xc0] sm:$0xff]  ;;  %769 = vst.msk [vmem:[#allocation2 + $0xe1] sm:$0xff] %vm258_vm0, %v691_v45  ;;  %v4716_v12 = vrot.slane %v3667_v43, 2  ;;  %2562 = vmatpush3.bf16.msra.mxu0 %v2756_v59 }
  0xe6   : > { %v3884_v0 = vpack.c.bf16 %v1111_v63, %v1109_v2  ;;  %v4717_v49 = vrot.slane %v3587_v4, 2  ;;  %v1055_v2 = vrot.slane %v3810_v10, 2  ;;  %v4718_v6 = vrot.slane %v3739_v53, 1  ;;  %770 = vst.msk [vmem:[#allocation2 + $0xf1] sm:$0xff] %vm258_vm0, %v692_v34  ;;  %2563 = vmatprep.subr.bf16.mxu0 %v2757_v26  ;;  %2730 = vmatpush3.bf16.msra.mxu1 %v2756_v59 }
  0xe7   : > { %v1166_v25 = vsel %vm902_vm3, %v4715_v8, %v4714_v54  ;;  %v4719_v62 = vrot.slane %v3725_v50, 1  ;;  %v931_v24 = vrot.slane %v3867_v1, 1  ;;  %v693_v4 = vmul.f32 %v2880_v23, %v3451_v9  ;;  %1322 = vrot.lane.b32.xlu1 %v3770_v30, %s2911_s26  ;;  %v3921_v8 = vld [vmem:[#allocation2 + $0xc8] sm:$0xff]  ;;  %2723 = vmatprep.subr.bf16.mxu1 %v2757_v26 }
  0xe8   : > { %4713 = vst [vmem:[#allocation12_spill] sm:$0xff] %v3884_v0  ;;  %v1054_v41 = vsel %vm1031_vm4, %v4717_v49, %v4716_v12  ;;  %v4720_v10 = vmov %v4714_v54  ;;  %v4721_v45 = vrot.slane %v3709_v33, 2  ;;  %v4722_v20 = vrot.slane %v3696_v52, 2 }
  0xe9   : > { %v930_v14 = vsel %vm902_vm3, %v4719_v62, %v4718_v6  ;;  %v1168_v46 = vsel %vm902_vm3, %v4720_v10, %v1167_v19  ;;  %v1175_v54 = vrot.slane %v834_v11, 2  ;;  %v4723_v9 = vmov %v4716_v12  ;;  %v2758_v11 = vld [vmem:[%s4657_s3 + $0x30] sm:$0xff]   ;;  %771 = vst.msk [vmem:[#allocation2 + $0xf9] sm:$0xff] %vm258_vm0, %v693_v4 }
  0xea   : > { %v1174_v63 = vsel %vm1031_vm4, %v4722_v20, %v4721_v45  ;;  %v3923_v18 = vpack.c.bf16 %v1168_v46, %v1166_v25  ;;  %v1056_v34 = vsel %vm1031_vm4, %v4723_v9, %v1055_v2  ;;  %v4724_v23 = vmov %v4718_v6  ;;  %v804_v6 = vld [vmem:[#allocation2 + $0xa0] sm:$0x3]  ;;  %v2882_v25 = vpop.eup %2881  ;;  %2564 = vmatpush3.bf16.msra.mxu0 %v2758_v11 }
  0xeb   : > { %v932_v12 = vsel %vm902_vm3, %v4724_v23, %v931_v24  ;;  %v4725_v19 = vrot.slane %v3739_v53, 2  ;;  %v4726_v49 = vrot.slane %v3725_v50, 2  ;;  %v3941_v43 = vpack.c.bf16 %v3921_v8, %v3891_v40  ;;  %1324 = vrot.lane.b32.xlu1 %v3804_v39, %s2911_s26  ;;  %v811_v4 = vld [vmem:[#allocation2 + $0xd8] sm:$0xff]  ;;  %2731 = vmatpush3.bf16.msra.mxu1 %v2758_v11 }
  0xec   : > { %v943_v2 = vrot.slane %v3891_v40, 1  ;;  %v1072_v62 = vrot.slane %v3891_v40, 2  ;;  %v3946_v50 = vpack.c.bf16 %v1056_v34, %v1054_v41  ;;  %v696_v24 = vmul.f32 %v2882_v25, %v3506_v38  ;;  %v3983_v25 = vld [vmem:[#allocation2 + $0xe0] sm:$0xff] }
  0xed   : > { %v1059_v52 = vsel %vm1031_vm4, %v4726_v49, %v4725_v19  ;;  %4727 = vst [vmem:[#allocation13_spill] sm:$0xff] %v3941_v43  ;;  %v3949_v10 = vpack.c.bf16 %v932_v12, %v930_v14  ;;  %v4728_v46 = vmov %v4721_v45  ;;  %v1060_v20 = vrot.slane %v3867_v1, 2  ;;  %1390 = vrot.lane.b32.xlu0 %v3941_v43, %s2909_s24  ;;  %v2759_v1 = vld [vmem:[%s4657_s3 + $0x78] sm:$0xff]   ;;  %v2884_v14 = vpop.eup %2883 }
  0xee   : > { %v1176_v45 = vsel %vm1031_vm4, %v4728_v46, %v1175_v54  ;;  %v4665_v9 = vrot.slane %v3921_v8, 1  ;;  %v4730_v38 = vrot.slane %v3766_v5, 1  ;;  %v4731_v33 = vrot.slane %v3757_v16, 1  ;;  %774 = vst.msk [vmem:[#allocation2 + $0x121] sm:$0xff] %vm258_vm0, %v696_v24  ;;  %v2760_v49 = vld [vmem:[%s4657_s3 + $0x38] sm:$0xff]   ;;  %2565 = vmatprep.subr.bf16.mxu0 %v2759_v1  ;;  %2724 = vmatprep.subr.bf16.mxu1 %v2759_v1 }
  0xef   : > { %v3960_v59 = vpack.c.bf16 %v1176_v45, %v1174_v63  ;;  %v936_v41 = vrot.slane %v804_v6, 1  ;;  %v1073_v26 = vrot.slane %v3921_v8, 2  ;;  %v4732_v63 = vmov %v4725_v19  ;;  %2566 = vmatpush3.bf16.msra.mxu0 %v2760_v49  ;;  %1326 = vrot.lane.b32.xlu1 %v3941_v43, %s2911_s26 }
  0xf0   : > { %v935_v40 = vsel %vm902_vm3, %v4731_v33, %v4730_v38  ;;  %v1061_v54 = vsel %vm1031_vm4, %v4732_v63, %v1060_v20  ;;  %v4733_v34 = vrot.slane %v3766_v5, 2  ;;  %v4734_v23 = vrot.slane %v3757_v16, 2  ;;  %v807_v20 = vld [vmem:[#allocation2 + $0xb8] sm:$0x3]  ;;  %v814_v33 = vld [vmem:[#allocation2 + $0xf0] sm:$0xff]  ;;  %2732 = vmatpush3.bf16.msra.mxu1 %v2760_v49 }
  0xf1   : > { %4729 = vst [vmem:[#allocation14_spill] sm:$0xff] %v3960_v59  ;;  %v1065_v19 = vrot.slane %v804_v6, 2  ;;  %v948_v46 = vrot.slane %v811_v4, 1  ;;  %v1077_v45 = vrot.slane %v811_v4, 2  ;;  %v697_v24 = vmul.f32 %v2884_v14, %v3624_v17 }
  0xf2   : > { %v1064_v12 = vsel %vm1031_vm4, %v4734_v23, %v4733_v34  ;;  %v3986_v53 = vpack.c.bf16 %v1061_v54, %v1059_v52  ;;  %v3989_v16 = vpack.c.bf16 %v3983_v25, %v811_v4  ;;  %v949_v6 = vrot.slane %v3983_v25, 1  ;;  %v810_v54 = vld [vmem:[#allocation2 + $0xd0] sm:$0x3] }
  0xf3   : > { %v1078_v38 = vrot.slane %v3983_v25, 2  ;;  %v4736_v63 = vrot.slane %v3766_v5, 1  ;;  %v953_v17 = vrot.slane %v814_v33, 1  ;;  %v1082_v52 = vrot.slane %v814_v33, 2  ;;  %775 = vst.msk [vmem:[#allocation2 + $0x129] sm:$0xff] %vm258_vm0, %v697_v24 }
  0xf4   : > { %4735 = vst [vmem:[#allocation15_spill] sm:$0xff] %v3989_v16  ;;  %v4737_v14 = vrot.slane %v3766_v5, 2  ;;  %1392 = vrot.lane.b32.xlu0 %v3989_v16, %s2909_s24  ;;  %v4739_v23 = vrot.slane %v3797_v37, 1  ;;  %v4740_v25 = vrot.slane %v3777_v57, 1  ;;  %v4741_v5 = vrot.slane %v3777_v57, 2  ;;  %1328 = vrot.lane.b32.xlu1 %v3989_v16, %s2911_s26 }
  0xf5   : > { %v937_v34 = vsel %vm902_vm3, %v4736_v63, %v936_v41  ;;  %v4006_v41 = vld [vmem:[#allocation2 + $0xf8] sm:$0xff]  ;;  %v946_v57 = vrot.slane %v810_v54, 1  ;;  %v4743_v49 = vrot.slane %v3797_v37, 2  ;;  %v4745_v16 = vrot.slane %v3921_v8, 1 }
  0xf6   : > { %v3999_v11 = vpack.c.bf16 %v937_v34, %v935_v40  ;;  %v1066_v4 = vsel %vm1031_vm4, %v4737_v14, %v1065_v19  ;;  %v940_v24 = vsel %vm902_vm3, %v4740_v25, %v4739_v23  ;;  %v941_v40 = vrot.slane %v807_v20, 1 }
  0xf7   : > { %v4008_v1 = vpack.c.bf16 %v1066_v4, %v1064_v12  ;;  %v1069_v19 = vsel %vm1031_vm4, %v4741_v5, %v4663_v32  ;;  %v4021_v63 = vpack.c.bf16 %v4006_v41, %v814_v33  ;;  %v954_v34 = vrot.slane %v4006_v41, 1  ;;  %v813_v32 = vld [vmem:[#allocation2 + $0xe8] sm:$0x3]  ;;  %v820_v33 = vld [vmem:[#allocation2 + $0x120] sm:$0xff] }
  0xf8   : > { %v1083_v12 = vrot.slane %v4006_v41, 2  ;;  %v1070_v14 = vrot.slane %v807_v20, 2  ;;  %v4742_v4 = vmov %v4739_v23  ;;  %v945_v25 = vsel %vm902_vm3, %v943_v2, %v4665_v9 }
  0xf9   : > { %4738 = vst [vmem:[#allocation16_spill] sm:$0xff] %v4008_v1  ;;  %v942_v23 = vsel %vm902_vm3, %v4742_v4, %v941_v40  ;;  %v1074_v5 = vsel %vm1031_vm4, %v1072_v62, %v1073_v26  ;;  %v1075_v41 = vrot.slane %v810_v54, 2  ;;  %v950_v40 = vsel %vm902_vm3, %v948_v46, %v949_v6  ;;  %v816_v4 = vld [vmem:[#allocation2 + $0x100] sm:$0x3]  ;;  %1394 = vrot.lane.b32.xlu0 %v4021_v63, %s2909_s24 }
  0xfa   : > { %v4034_v43 = vpack.c.bf16 %v942_v23, %v940_v24  ;;  %v1071_v20 = vsel %vm1031_vm4, %v4743_v49, %v1070_v14  ;;  %v963_v2 = vrot.slane %v820_v33, 1  ;;  %v1092_v62 = vrot.slane %v820_v33, 2  ;;  %v821_v46 = vld [vmem:[#allocation2 + $0x128] sm:$0xff]  ;;  %v822_v49 = vld [vmem:[#allocation2 + $0x130] sm:$0x3] }
  0xfb   : > { %v4042_v9 = vpack.c.bf16 %v1071_v20, %v1069_v19  ;;  %v947_v24 = vsel %vm902_vm3, %v4745_v16, %v946_v57  ;;  %v1076_v37 = vsel %vm1031_vm4, %v1073_v26, %v1075_v41  ;;  %v951_v14 = vrot.slane %v813_v32, 1 }
  0xfc   : > { %v4047_v23 = vpack.c.bf16 %v947_v24, %v945_v25  ;;  %v1079_v54 = vsel %vm1031_vm4, %v1077_v45, %v1078_v38  ;;  %v4051_v39 = vpack.c.bf16 %v1076_v37, %v1074_v5  ;;  %v1080_v30 = vrot.slane %v813_v32, 2 }
  0xfd   : > { %4744 = vst [vmem:[#allocation17_spill] sm:$0xff] %v4042_v9  ;;  %v955_v48 = vsel %vm902_vm3, %v953_v17, %v954_v34  ;;  %v956_v19 = vrot.slane %v816_v4, 1  ;;  %v964_v20 = vrot.slane %v821_v46, 1  ;;  %v966_v31 = vrot.slane %v822_v49, 1  ;;  %1345 = vrot.lane.b32.xlu0 %v3684_v35, %s2910_s25 }
  0xfe   : > { %4746 = vst [vmem:[#allocation18_spill] sm:$0xff] %v4047_v23  ;;  %4747 = vst [vmem:[#allocation19_spill] sm:$0xff] %v4051_v39  ;;  %v1093_v8 = vrot.slane %v821_v46, 2  ;;  %v1095_v22 = vrot.slane %v822_v49, 2  ;;  %v952_v26 = vsel %vm902_vm3, %v949_v6, %v951_v14  ;;  %v1081_v45 = vsel %vm1031_vm4, %v1078_v38, %v1080_v30 }
  0xff   : > { %v957_v16 = vsel %vm902_vm3, %v954_v34, %v956_v19  ;;  %v1084_v32 = vsel %vm1031_vm4, %v1082_v52, %v1083_v12  ;;  %v965_v17 = vsel %vm902_vm3, %v963_v2, %v964_v20  ;;  %v967_v25 = vsel %vm902_vm3, %v964_v20, %v966_v31  ;;  %v2893_v34 = vld [vmem:[%s3002_s23 + $0xa0] sm:$0xff]  ;;  %v2894_v2 = vld [vmem:[%s3002_s23 + $0xa8] sm:$0xff] }
 0x100   : > { %v1094_v57 = vsel %vm1031_vm4, %v1092_v62, %v1093_v8  ;;  %v1096_v5 = vsel %vm1031_vm4, %v1093_v8, %v1095_v22  ;;  %v4066_v41 = vpack.c.bf16 %v3718_v21, %v3691_v58  ;;  %v4068_v6 = vpack.c.bf16 %v967_v25, %v965_v17  ;;  %v4148_v17 = vld [vmem:[%s4657_s3 + $0x80] sm:$0xff]  }
 0x101   : > { %v4070_v24 = vpack.c.bf16 %v952_v26, %v950_v40  ;;  %v4072_v30 = vpack.c.bf16 %v1081_v45, %v1079_v54  ;;  %v4074_v38 = vpack.c.bf16 %v957_v16, %v955_v48  ;;  %v1085_v52 = vrot.slane %v816_v4, 2  ;;  %1412 = vrot.lane.b32.xlu0 %v3699_v51, %s2911_s26  ;;  %2681 = vmatprep.subr.bf16.mxu1 %v4148_v17 }
 0x102   : > { %4748 = vst [vmem:[#allocation20_spill] sm:$0xff] %v4066_v41  ;;  %v464_v31 = vmul.f32 %v2893_v34, %v3276_v28  ;;  %v465_v62 = vmul.f32 %v2894_v2, %v3276_v28  ;;  %1240 = vrot.lane.b32.xlu1 %v4068_v6, %s2910_s25  ;;  %v4084_v22 = vpack.c.bf16 %v1096_v5, %v1094_v57  ;;  %v4751_v58 = vrot.slane %v3537_v61, 1  ;;  %v4161_v57 = vpop.permute.xlu1 %1264 }
 0x103   : > { %4749 = vst [vmem:[#allocation21_spill] sm:$0xff] %v4070_v24  ;;  %4750 = vst [vmem:[#allocation22_spill] sm:$0xff] %v4072_v30  ;;  %v4752_v21 = vrot.slane %v3532_v55, 1  ;;  %v4091_v40 = vpack.c.bf16 %v821_v46, %v820_v33  ;;  %v4753_v4 = vrot.slane %v3576_v42, 1  ;;  %v1086_v14 = vsel %vm1031_vm4, %v1083_v12, %v1085_v52 }
 0x104   : > { %v4754_v28 = vmov %v4751_v58  ;;  %v502_v54 = vadd.f32 %v3292_v44, %v464_v31  ;;  %v503_v49 = vadd.f32 %v3292_v44, %v465_v62  ;;  %v4101_v19 = vpack.c.bf16 %v1086_v14, %v1084_v32  ;;  %v4143_v32 = vpop.permute.xlu0 %1408 }
 0x105   : > { %v910_v48 = vsel %vm902_vm3, %v4752_v21, %v4751_v58  ;;  %v912_v37 = vsel %vm902_vm3, %v4754_v28, %v4753_v4  ;;  %1369 = vrot.lane.b32.xlu0 %v4066_v41, %s2910_s25 }
 0x106   : > { %v534_v20 = vsub.f32 0.0, %v502_v54  ;;  %v535_v55 = vsub.f32 0.0, %v503_v49  ;;  %1288 = vrot.lane.b32.xlu1 %v4084_v22, %s2909_s24  ;;  %v4107_v42 = vpack.c.bf16 %v912_v37, %v910_v48 }
 0x108   : > { %v586_v61 = vmul.f32 1.442695, %v534_v20  ;;  %v588_v33 = vmul.f32 1.442695, %v535_v55  ;;  %v4159_v25 = vpop.permute.xlu0 %1216 }
 0x109   : > { %1436 = vrot.lane.b32.xlu0 %v3643_v36, %s2911_s26 }
 0x10a   : > { %2885 = vpow2.f32 %v586_v61  ;;  %1218 = vrot.lane.b32.xlu1 %v4107_v42, %s2910_s25 }
 0x10b   : > { %2887 = vpow2.f32 %v588_v33 }
 0x10c   : > { %v4167_v5 = vpop.permute.xlu0 %1442 }
 0x10d   : > { %1347 = vrot.lane.b32.xlu0 %v3670_v56, %s2910_s25 }
 0x10e   : > { %1266 = vrot.lane.b32.xlu1 %v3684_v35, %s2909_s24 }
 0x111   : > { %1414 = vrot.lane.b32.xlu0 %v3701_v29, %s2911_s26 }
 0x112   : > { %1242 = vrot.lane.b32.xlu1 %v3859_v7, %s2910_s25 }
 0x114   : > { %v2886_v44 = vpop.eup %2885 }
 0x115   : > { %v2888_v12 = vpop.eup %2887  ;;  %v630_v46 = vadd.f32 1.0, %v2886_v44  ;;  %1371 = vrot.lane.b32.xlu0 %v3808_v47, %s2910_s25 }
 0x116   : > { %v631_v8 = vadd.f32 1.0, %v2888_v12  ;;  %1290 = vrot.lane.b32.xlu1 %v4066_v41, %s2909_s24 }
 0x117   : > { %2889 = vrcp.f32 %v630_v46 }
 0x118   : > { %2891 = vrcp.f32 %v631_v8 }
 0x119   : > { %1438 = vrot.lane.b32.xlu0 %v3835_v3, %s2911_s26 }
 0x11a   : > { %1220 = vrot.lane.b32.xlu1 %v3699_v51, %s2910_s25 }
 0x11d   : > { %1349 = vrot.lane.b32.xlu0 %v3870_v15, %s2910_s25 }
 0x11e   : > { %1268 = vrot.lane.b32.xlu1 %v3670_v56, %s2909_s24 }
 0x121   : > { %v2890_v35 = vpop.eup %2889  ;;  %1416 = vrot.lane.b32.xlu0 %v3872_v27, %s2911_s26 }
 0x122   : > { %v2892_v26 = vpop.eup %2891  ;;  %v694_v45 = vmul.f32 %v2890_v35, %v502_v54  ;;  %1244 = vrot.lane.b32.xlu1 %v3643_v36, %s2910_s25 }
 0x123   : > { %v695_v16 = vmul.f32 %v2892_v26, %v503_v49 }
 0x124   : > { %772 = vst.msk [vmem:[#allocation2 + $0x109] sm:$0xff] %vm258_vm0, %v694_v45 }
 0x125   : > { %773 = vst.msk [vmem:[#allocation2 + $0x111] sm:$0xff] %vm258_vm0, %v695_v16  ;;  %1373 = vrot.lane.b32.xlu0 %v3884_v0, %s2910_s25 }
 0x126   : > { %1292 = vrot.lane.b32.xlu1 %v3808_v47, %s2909_s24 }
 0x129   : > { %1440 = vrot.lane.b32.xlu0 %v3923_v18, %s2911_s26 }
 0x12a   : > { %1222 = vrot.lane.b32.xlu1 %v3701_v29, %s2910_s25 }
 0x12b   : > { %v817_v33 = vld [vmem:[#allocation2 + $0x108] sm:$0xff] }
 0x12c   : > { %v818_v44 = vld [vmem:[#allocation2 + $0x110] sm:$0xff]  ;;  %v819_v12 = vld [vmem:[#allocation2 + $0x118] sm:$0x3]  ;;  %v958_v8 = vrot.slane %v817_v33, 1 }
 0x12d   : > { %1351 = vrot.lane.b32.xlu0 %v3946_v50, %s2910_s25  ;;  %v959_v35 = vrot.slane %v818_v44, 1  ;;  %v961_v26 = vrot.slane %v819_v12, 1  ;;  %v4253_v16 = vpack.c.bf16 %v818_v44, %v817_v33  ;;  %v1088_v47 = vrot.slane %v818_v44, 2 }
 0x12e   : > { %1270 = vrot.lane.b32.xlu1 %v3870_v15, %s2909_s24 }
 0x12f   : > { %v4179_v34 = vpop.permute.xlu0 %1402  ;;  %v960_v41 = vsel %vm902_vm3, %v958_v8, %v959_v35 }
 0x131   : > { %1418 = vrot.lane.b32.xlu0 %v3949_v10, %s2911_s26  ;;  %v4173_v52 = vpop.permute.xlu1 %1378 }
 0x132   : > { %1246 = vrot.lane.b32.xlu1 %v3835_v3, %s2910_s25 }
 0x133   : > { %v4189_v62 = vpop.permute.xlu0 %1380 }
 0x135   : > { %1375 = vrot.lane.b32.xlu0 %v3960_v59, %s2910_s25  ;;  %v4181_v31 = vpop.permute.xlu1 %1312  ;;  %v1087_v59 = vrot.slane %v817_v33, 2 }
 0x136   : > { %1294 = vrot.lane.b32.xlu1 %v3884_v0, %s2909_s24 }
 0x137   : > { %v4201_v21 = vpop.permute.xlu0 %1404  ;;  %v1089_v33 = vsel %vm1031_vm4, %v1087_v59, %v1088_v47 }
 0x139   : > { %1353 = vrot.lane.b32.xlu0 %v3986_v53, %s2910_s25  ;;  %v4187_v2 = vpop.permute.xlu1 %1336 }
 0x13a   : > { %1224 = vrot.lane.b32.xlu1 %v3872_v27, %s2910_s25 }
 0x13d   : > { %1420 = vrot.lane.b32.xlu0 %v3999_v11, %s2911_s26  ;;  %v4195_v58 = vpop.permute.xlu1 %1314 }
 0x13e   : > { %1272 = vrot.lane.b32.xlu1 %v3946_v50, %s2909_s24 }
 0x141   : > { %1355 = vrot.lane.b32.xlu0 %v4008_v1, %s2910_s25  ;;  %v4203_v48 = vpop.permute.xlu1 %1338 }
 0x142   : > { %1226 = vrot.lane.b32.xlu1 %v3949_v10, %s2910_s25 }
 0x145   : > { %1422 = vrot.lane.b32.xlu0 %v4034_v43, %s2911_s26  ;;  %v4209_v4 = vpop.permute.xlu1 %1316 }
 0x146   : > { %1274 = vrot.lane.b32.xlu1 %v3986_v53, %s2909_s24 }
 0x147   : > { %v4211_v28 = vpop.permute.xlu0 %1382 }
 0x149   : > { %1357 = vrot.lane.b32.xlu0 %v4042_v9, %s2910_s25  ;;  %v4217_v37 = vpop.permute.xlu1 %1340 }
 0x14a   : > { %1228 = vrot.lane.b32.xlu1 %v3999_v11, %s2910_s25 }
 0x14b   : > { %v4219_v14 = vpop.permute.xlu0 %1406 }
 0x14d   : > { %1424 = vrot.lane.b32.xlu0 %v4047_v23, %s2911_s26  ;;  %v4225_v54 = vpop.permute.xlu1 %1318 }
 0x14e   : > { %1276 = vrot.lane.b32.xlu1 %v4008_v1, %s2909_s24 }
 0x14f   : > { %v4227_v49 = vpop.permute.xlu0 %1384 }
 0x151   : > { %1359 = vrot.lane.b32.xlu0 %v4051_v39, %s2910_s25  ;;  %v4233_v20 = vpop.permute.xlu1 %1342 }
 0x152   : > { %1230 = vrot.lane.b32.xlu1 %v4034_v43, %s2910_s25 }
 0x153   : > { %v4235_v55 = vpop.permute.xlu0 %1386 }
 0x155   : > { %1426 = vrot.lane.b32.xlu0 %v4070_v24, %s2911_s26  ;;  %v4241_v61 = vpop.permute.xlu1 %1320 }
 0x156   : > { %1278 = vrot.lane.b32.xlu1 %v4042_v9, %s2909_s24  ;;  %v1090_v9 = vrot.slane %v819_v12, 2 }
 0x157   : > { %v4243_v46 = vpop.permute.xlu0 %1388 }
 0x159   : > { %1361 = vrot.lane.b32.xlu0 %v4072_v30, %s2910_s25  ;;  %v4249_v45 = vpop.permute.xlu1 %1322 }
 0x15a   : > { %1232 = vrot.lane.b32.xlu1 %v4047_v23, %s2910_s25 }
 0x15d   : > { %1428 = vrot.lane.b32.xlu0 %v4074_v38, %s2911_s26  ;;  %v4261_v23 = vpop.permute.xlu1 %1324 }
 0x15e   : > { %1280 = vrot.lane.b32.xlu1 %v4051_v39, %s2909_s24  ;;  %v962_v39 = vsel %vm902_vm3, %v959_v35, %v961_v26  ;;  %4755 = vst [vmem:[#allocation23_spill] sm:$0xff] %v4261_v23  ;;  %v2896_v35 = vld [vmem:[#allocation2 + $0x1a0] sm:$0xff] }
 0x15f   : > { %v4257_v0 = vpop.permute.xlu0 %1390  ;;  %v4265_v1 = vpack.c.bf16 %v962_v39, %v960_v41  ;;  %v2895_v39 = vld [vmem:[#allocation2 + $0x198] sm:$0xff]  ;;  %v1193_v26 = vrot.slane %v2896_v35, 2 }
 0x160   : > { %v1192_v41 = vrot.slane %v2895_v39, 2 }
 0x161   : > { %1363 = vrot.lane.b32.xlu0 %v4101_v19, %s2910_s25  ;;  %v4273_v8 = vpop.permute.xlu1 %1326 }
 0x162   : > { %1234 = vrot.lane.b32.xlu1 %v4070_v24, %s2910_s25  ;;  %v1091_v24 = vsel %vm1031_vm4, %v1088_v47, %v1090_v9  ;;  %v2898_v47 = vld [vmem:[#allocation2 + $0x8] sm:$0xff]  ;;  %v2899_v9 = vld [vmem:[#allocation2] sm:$0xff]  ;;  %v4290_v39 = vsel %vm1031_vm4, %v1192_v41, %v1193_v26 }
 0x163   : > { %v4277_v12 = vpack.c.bf16 %v1091_v24, %v1089_v33 }
 0x165   : > { %1396 = vrot.lane.b32.xlu0 %v4253_v16, %s2909_s24 }
 0x166   : > { %1282 = vrot.lane.b32.xlu1 %v4072_v30, %s2909_s24  ;;  %v4271_v44 = vpop.permute.xlu0 %1392  ;;  %v2897_v30 = vld [vmem:[#allocation2 + $0x1a8] sm:$0x3]  ;;  %v4287_v24 = vpop.permute.xlu1 %1328 }
 0x167   : > { %4756 = vst [vmem:[#allocation24_spill] sm:$0xff] %v4271_v44  ;;  %v1195_v59 = vrot.slane %v2897_v30, 2  ;;  %v838_v44 = vpack.c.bf16 %v2898_v47, %v2899_v9 }
 0x169   : > { %1430 = vrot.lane.b32.xlu0 %v4265_v1, %s2911_s26  ;;  %v4293_v35 = vsel %vm1031_vm4, %v1193_v26, %v1195_v59  ;;  %v1446_v9 = vsel %vm258_vm0, %v838_v44, %v4159_v25 }
 0x16a   : > { %1330 = vrot.lane.b32.xlu1 %v4021_v63, %s2911_s26  ;;  %v1199_v47 = vpack.c.bf16 %v4293_v35, %v4290_v39 }
 0x16b   : > { %v4281_v23 = vpop.permute.xlu0 %1394 }
 0x16d   : > { %1365 = vrot.lane.b32.xlu0 %v4277_v12, %s2910_s25 }
 0x16e   : > { %1236 = vrot.lane.b32.xlu1 %v4074_v38, %s2910_s25 }
 0x16f   : > { %v1346_v33 = vpop.permute.xlu0 %1345 }
 0x170   : > { %v1576_v30 = vsel %vm258_vm0, %v4107_v42, %v1346_v33  ;;  %v1494_v42 = vsel %vm1492_vm5, %v1446_v9, %v4161_v57 }
 0x171   : > { %1398 = vrot.lane.b32.xlu0 %v4091_v40, %s2909_s24  ;;  %v1623_v26 = vsel %vm1492_vm5, %v1576_v30, %v4173_v52  ;;  %v1527_v25 = vsel %vm1525_vm6, %v1494_v42, %v4181_v31 }
 0x172   : > { %1284 = vrot.lane.b32.xlu1 %v4101_v19, %s2909_s24 }
 0x173   : > { %v1413_v41 = vpop.permute.xlu0 %1412 }
 0x174   : > { %v1241_v59 = vpop.permute.xlu1 %1240  ;;  %v1655_v33 = vsel %vm1525_vm6, %v1623_v26, %v1413_v41 }
 0x175   : > { %1933 = vmatprep.mubr.bf16.mxu0 %v1655_v33  ;;  %1432 = vrot.lane.b32.xlu0 %v4068_v6, %s2911_s26  ;;  %v1482_v52 = vsel %vm258_vm0, %v4091_v40, %v1241_v59  ;;  %v2762_v33 = vld [vmem:[%s4657_s3 + $0x88] sm:$0xff]  }
 0x176   : > { %1934 = vmatmul.mubr.bf16.vlgmr.msra.gmra.mrb[0].mxu0 %v1527_v25  ;;  %1332 = vrot.lane.b32.xlu1 %v4253_v16, %s2911_s26 }
 0x177   : > { %v1370_v44 = vpop.permute.xlu0 %1369 }
 0x178   : > { %v1289_v30 = vpop.permute.xlu1 %1288  ;;  %v1612_v57 = vsel %vm258_vm0, %v3859_v7, %v1370_v44 }
 0x179   : > { %v1518_v9 = vsel %vm1492_vm5, %v1482_v52, %v1289_v30  ;;  %1367 = vrot.lane.b32.xlu0 %v4084_v22, %s2910_s25  ;;  %v1647_v41 = vsel %vm1492_vm5, %v1612_v57, %v4179_v34 }
 0x17a   : > { %1238 = vrot.lane.b32.xlu1 %v4265_v1, %s2910_s25  ;;  %v1563_v26 = vsel %vm1525_vm6, %v1518_v9, %v4187_v2 }
 0x17b   : > { %v1437_v31 = vpop.permute.xlu0 %1436 }
 0x17c   : > { %v1219_v59 = vpop.permute.xlu1 %1218  ;;  %v1691_v42 = vsel %vm1525_vm6, %v1647_v41, %v1437_v31 }
 0x17d   : > { %2029 = vmatprep.mubr.bf16.mxu1 %v1691_v42  ;;  %1400 = vrot.lane.b32.xlu0 %v3573_v13, %s2909_s24  ;;  %v1449_v34 = vsel %vm258_vm0, %v3545_v60, %v1219_v59 }
 0x17e   : > { %2030 = vmatmul.mubr.bf16.vlgmr.msra.gmra.mrb[0].mxu1 %v1563_v26  ;;  %1286 = vrot.lane.b32.xlu1 %v4277_v12, %s2909_s24 }
 0x17f   : > { %v1348_v25 = vpop.permute.xlu0 %1347  ;;  %2682 = vmatpush3.bf16.msra.mxu1 %v4148_v17 }
 0x180   : > { %v1267_v2 = vpop.permute.xlu1 %1266  ;;  %v1579_v44 = vsel %vm258_vm0, %v3699_v51, %v1348_v25  ;;  %2683 = vmatprep.subr.bf16.mxu1 %v2762_v33 }
 0x181   : > { %v1496_v52 = vsel %vm1492_vm5, %v1449_v34, %v1267_v2  ;;  %1434 = vrot.lane.b32.xlu0 %v3859_v7, %s2911_s26  ;;  %v1625_v57 = vsel %vm1492_vm5, %v1579_v44, %v4189_v62 }
 0x182   : > { %1334 = vrot.lane.b32.xlu1 %v4091_v40, %s2911_s26  ;;  %v1530_v60 = vsel %vm1525_vm6, %v1496_v52, %v4195_v58  ;;  %s2518_s26 = sshll.u32 %s4780_s19, 7 }
 0x183   : > { %v1415_v30 = vpop.permute.xlu0 %1414  ;;  %2684 = vmatpush3.bf16.msra.mxu1 %v2762_v33  ;;  %s4541_s30 = scalar_lea.vmem %s4659_s5, %s2518_s26 }
 0x184   : > { %v1243_v17 = vpop.permute.xlu1 %1242  ;;  %v1658_v51 = vsel %vm1525_vm6, %v1625_v57, %v1415_v30 }
 0x185   : > { %1941 = vmatprep.mubr.bf16.mxu0 %v1658_v51  ;;  %v1485_v7 = vsel %vm258_vm0, %v3573_v13, %v1243_v17  ;;  %v4757_v13 = vld [vmem:[#allocation4_spill] sm:$0xff] }
 0x186   : > { %1942 = vmatmul.mubr.bf16.gmra.mrb[4].mxu0 %v1530_v60  ;;  %v4758_v60 = vld [vmem:[#allocation3_spill] sm:$0xff] }
 0x187   : > { %v1372_v9 = vpop.permute.xlu0 %1371 }
 0x188   : > { %v1291_v31 = vpop.permute.xlu1 %1290  ;;  %v1615_v40 = vsel %vm258_vm0, %v3643_v36, %v1372_v9 }
 0x189   : > { %v1520_v41 = vsel %vm1492_vm5, %v1485_v7, %v1291_v31  ;;  %v1649_v58 = vsel %vm1492_vm5, %v1615_v40, %v4201_v21 }
 0x18a   : > { %v1566_v26 = vsel %vm1525_vm6, %v1520_v41, %v4203_v48 }
 0x18b   : > { %v1439_v62 = vpop.permute.xlu0 %1438 }
 0x18c   : > { %v1221_v59 = vpop.permute.xlu1 %1220  ;;  %v1694_v42 = vsel %vm1525_vm6, %v1649_v58, %v1439_v62  ;;  %v4759_v62 = vld [vmem:[#allocation5_spill] sm:$0xff] }
 0x18d   : > { %2037 = vmatprep.mubr.bf16.mxu1 %v1694_v42  ;;  %v1452_v25 = vsel %vm258_vm0, %v4757_v13, %v1221_v59 }
 0x18e   : > { %2038 = vmatmul.mubr.bf16.gmra.mrb[4].mxu1 %v1566_v26 }
 0x18f   : > { %v1350_v33 = vpop.permute.xlu0 %1349 }
 0x190   : > { %v1269_v34 = vpop.permute.xlu1 %1268  ;;  %v1582_v36 = vsel %vm258_vm0, %v3701_v29, %v1350_v33 }
 0x191   : > { %v1498_v2 = vsel %vm1492_vm5, %v1452_v25, %v1269_v34  ;;  %v1627_v21 = vsel %vm1492_vm5, %v1582_v36, %v4211_v28  ;;  %v4760_v34 = vld [vmem:[#allocation6_spill] sm:$0xff] }
 0x192   : > { %v1533_v48 = vsel %vm1525_vm6, %v1498_v2, %v4209_v4 }
 0x193   : > { %v1417_v44 = vpop.permute.xlu0 %1416 }
 0x194   : > { %v1245_v52 = vpop.permute.xlu1 %1244  ;;  %v1661_v30 = vsel %vm1525_vm6, %v1627_v21, %v1417_v44 }
 0x195   : > { %1949 = vmatprep.mubr.bf16.mxu0 %v1661_v30  ;;  %v1488_v17 = vsel %vm258_vm0, %v4758_v60, %v1245_v52 }
 0x196   : > { %1950 = vmatmul.mubr.bf16.gmra.mrb[8].mxu0 %v1533_v48 }
 0x197   : > { %v1374_v57 = vpop.permute.xlu0 %1373 }
 0x198   : > { %v1293_v51 = vpop.permute.xlu1 %1292  ;;  %v1618_v29 = vsel %vm258_vm0, %v3835_v3, %v1374_v57  ;;  %v4761_v57 = vld [vmem:[#allocation7_spill] sm:$0xff] }
 0x199   : > { %v1522_v9 = vsel %vm1492_vm5, %v1488_v17, %v1293_v51  ;;  %v1651_v28 = vsel %vm1492_vm5, %v1618_v29, %v4219_v14 }
 0x19a   : > { %v1569_v4 = vsel %vm1525_vm6, %v1522_v9, %v4217_v37 }
 0x19b   : > { %v1441_v7 = vpop.permute.xlu0 %1440 }
 0x19c   : > { %v1223_v31 = vpop.permute.xlu1 %1222  ;;  %v1697_v40 = vsel %vm1525_vm6, %v1651_v28, %v1441_v7  ;;  %v4762_v7 = vld [vmem:[#allocation8_spill] sm:$0xff] }
 0x19d   : > { %2045 = vmatprep.mubr.bf16.mxu1 %v1697_v40  ;;  %v1455_v58 = vsel %vm258_vm0, %v4759_v62, %v1223_v31 }
 0x19e   : > { %2046 = vmatmul.mubr.bf16.gmra.mrb[8].mxu1 %v1569_v4 }
 0x19f   : > { %v1352_v41 = vpop.permute.xlu0 %1351 }
 0x1a0   : > { %v1271_v26 = vpop.permute.xlu1 %1270  ;;  %v1585_v3 = vsel %vm258_vm0, %v3872_v27, %v1352_v41 }
 0x1a1   : > { %v1500_v59 = vsel %vm1492_vm5, %v1455_v58, %v1271_v26  ;;  %v1629_v14 = vsel %vm1492_vm5, %v1585_v3, %v4227_v49  ;;  %v4764_v58 = vld [vmem:[#allocation9_spill] sm:$0xff] }
 0x1a2   : > { %v1536_v37 = vsel %vm1525_vm6, %v1500_v59, %v4225_v54 }
 0x1a3   : > { %v1419_v42 = vpop.permute.xlu0 %1418 }
 0x1a4   : > { %v1247_v33 = vpop.permute.xlu1 %1246  ;;  %v1664_v13 = vsel %vm1525_vm6, %v1629_v14, %v1419_v42 }
 0x1a5   : > { %1957 = vmatprep.mubr.bf16.mxu0 %v1664_v13  ;;  %v1491_v36 = vsel %vm258_vm0, %v4760_v34, %v1247_v33  ;;  %v4767_v13 = vld [vmem:[#allocation17_spill] sm:$0xff]  ;;  %v4769_v34 = vld [vmem:[#allocation24_spill] sm:$0xff] }
 0x1a6   : > { %1958 = vmatmul.mubr.bf16.gmra.mrb[12].mxu0 %v1536_v37  ;;  %v4766_v37 = vld [vmem:[#allocation18_spill] sm:$0xff] }
 0x1a7   : > { %v1376_v25 = vpop.permute.xlu0 %1375 }
 0x1a8   : > { %v1295_v2 = vpop.permute.xlu1 %1294  ;;  %v1621_v27 = vsel %vm258_vm0, %v3923_v18, %v1376_v25 }
 0x1a9   : > { %v1524_v44 = vsel %vm1492_vm5, %v1491_v36, %v1295_v2  ;;  %v1653_v49 = vsel %vm1492_vm5, %v1621_v27, %v4143_v32  ;;  %v4770_v2 = vld [vmem:[#allocation10_spill] sm:$0xff] }
 0x1aa   : > { %v1572_v54 = vsel %vm1525_vm6, %v1524_v44, %v4233_v20  ;;  %v1700_v21 = vsel %vm1525_vm6, %v1653_v49, %v4167_v5 }
 0x1ab   : > { %v1354_v48 = vpop.permute.xlu0 %1353  ;;  %2053 = vmatprep.mubr.bf16.mxu1 %v1700_v21 }
 0x1ac   : > { %v1225_v52 = vpop.permute.xlu1 %1224  ;;  %v1588_v30 = vsel %vm258_vm0, %v3949_v10, %v1354_v48  ;;  %2054 = vmatmul.mubr.bf16.gmra.mrb[12].mxu1 %v1572_v54 }
 0x1ad   : > { %2685 = vmatprep.mubr.msk.bf16.mxu1 %vm258_vm0, %v3670_v56  ;;  %v1631_v32 = vsel %vm1492_vm5, %v1588_v30, %v4235_v55  ;;  %v1458_v20 = vsel %vm258_vm0, %v4761_v57, %v1225_v52  ;;  %v4771_v30 = vld [vmem:[#allocation21_spill] sm:$0xff] }
 0x1af   : > { %v1421_v18 = vpop.permute.xlu0 %1420 }
 0x1b0   : > { %v1273_v60 = vpop.permute.xlu1 %1272  ;;  %v1667_v5 = vsel %vm1525_vm6, %v1631_v32, %v1421_v18  ;;  %v4772_v32 = vld [vmem:[#allocation22_spill] sm:$0xff] }
 0x1b1   : > { %v1502_v17 = vsel %vm1492_vm5, %v1458_v20, %v1273_v60  ;;  %1965 = vmatprep.mubr.bf16.mxu0 %v1667_v5  ;;  %v4773_v60 = vld [vmem:[#allocation13_spill] sm:$0xff] }
 0x1b2   : > { %v1539_v10 = vsel %vm1525_vm6, %v1502_v17, %v4241_v61 }
 0x1b3   : > { %1966 = vmatmul.mubr.bf16.gmra.mrb[16].mxu0 %v1539_v10  ;;  %v1356_v51 = vpop.permute.xlu0 %1355 }
 0x1b4   : > { %v1227_v29 = vpop.permute.xlu1 %1226  ;;  %v1591_v56 = vsel %vm258_vm0, %v3999_v11, %v1356_v51  ;;  %2686 = vmatmul.mubr.msk.bf16.vlgmr.msra.gmra.mrb[16].mxu1 %vm258_vm0, %v3870_v15 }
 0x1b5   : > { %2689 = vmatprep.mubr.msk.bf16.mxu1 %vm258_vm0, %v3946_v50  ;;  %v1633_v9 = vsel %vm1492_vm5, %v1591_v56, %v4243_v46  ;;  %v1461_v28 = vsel %vm258_vm0, %v4762_v7, %v1227_v29  ;;  %v4763_v46 = vld [vmem:[#allocation16_spill] sm:$0xff]  ;;  %v4774_v7 = vld [vmem:[#allocation15_spill] sm:$0xff] }
 0x1b7   : > { %v1423_v55 = vpop.permute.xlu0 %1422 }
 0x1b8   : > { %v1275_v61 = vpop.permute.xlu1 %1274  ;;  %v1670_v4 = vsel %vm1525_vm6, %v1633_v9, %v1423_v55 }
 0x1b9   : > { %v1504_v31 = vsel %vm1492_vm5, %v1461_v28, %v1275_v61  ;;  %1973 = vmatprep.mubr.bf16.mxu0 %v1670_v4 }
 0x1ba   : > { %v1542_v11 = vsel %vm1525_vm6, %v1504_v31, %v4249_v45 }
 0x1bb   : > { %1974 = vmatmul.mubr.bf16.gmra.mrb[20].mxu0 %v1542_v11  ;;  %v1358_v15 = vpop.permute.xlu0 %1357 }
 0x1bc   : > { %v1229_v40 = vpop.permute.xlu1 %1228  ;;  %v1594_v50 = vsel %vm258_vm0, %v4034_v43, %v1358_v15  ;;  %2690 = vmatmul.mubr.msk.bf16.gmra.mrb[20].mxu1 %vm258_vm0, %v3986_v53  ;;  %v4765_v43 = vld [vmem:[#allocation23_spill] sm:$0xff] }
 0x1bd   : > { %2693 = vmatprep.mubr.msk.bf16.mxu1 %vm258_vm0, %v4763_v46  ;;  %v1635_v62 = vsel %vm1492_vm5, %v1594_v50, %v4257_v0  ;;  %v1464_v26 = vsel %vm258_vm0, %v4764_v58, %v1229_v40  ;;  %v4768_v0 = vld [vmem:[#allocation19_spill] sm:$0xff]  ;;  %v4778_v58 = vld [vmem:[#allocation14_spill] sm:$0xff] }
 0x1bf   : > { %v1425_v41 = vpop.permute.xlu0 %1424 }
 0x1c0   : > { %v1277_v45 = vpop.permute.xlu1 %1276  ;;  %v1673_v3 = vsel %vm1525_vm6, %v1635_v62, %v1425_v41  ;;  %v4777_v41 = vld [vmem:[#allocation12_spill] sm:$0xff] }
 0x1c1   : > { %v1506_v59 = vsel %vm1492_vm5, %v1464_v26, %v1277_v45  ;;  %1981 = vmatprep.mubr.bf16.mxu0 %v1673_v3 }
 0x1c2   : > { %v1545_v42 = vsel %vm1525_vm6, %v1506_v59, %v4765_v43 }
 0x1c3   : > { %1982 = vmatmul.mubr.bf16.gmra.mrb[24].mxu0 %v1545_v42  ;;  %v1360_v53 = vpop.permute.xlu0 %1359 }
 0x1c4   : > { %v1231_v14 = vpop.permute.xlu1 %1230  ;;  %v1597_v33 = vsel %vm258_vm0, %v4766_v37, %v1360_v53  ;;  %2694 = vmatmul.mubr.msk.bf16.gmra.mrb[24].mxu1 %vm258_vm0, %v4767_v13 }
 0x1c5   : > { %2697 = vmatprep.mubr.msk.bf16.mxu1 %vm258_vm0, %v4768_v0  ;;  %v1637_v36 = vsel %vm1492_vm5, %v1597_v33, %v4769_v34  ;;  %v1467_v27 = vsel %vm258_vm0, %v4770_v2, %v1231_v14 }
 0x1c7   : > { %v1427_v25 = vpop.permute.xlu0 %1426 }
 0x1c8   : > { %v1279_v44 = vpop.permute.xlu1 %1278  ;;  %v1676_v49 = vsel %vm1525_vm6, %v1637_v36, %v1427_v25 }
 0x1c9   : > { %v1508_v54 = vsel %vm1492_vm5, %v1467_v27, %v1279_v44  ;;  %1989 = vmatprep.mubr.bf16.mxu0 %v1676_v49 }
 0x1ca   : > { %v1548_v21 = vsel %vm1525_vm6, %v1508_v54, %v4273_v8 }
 0x1cb   : > { %1990 = vmatmul.mubr.bf16.gmra.mrb[28].mxu0 %v1548_v21  ;;  %v1362_v48 = vpop.permute.xlu0 %1361 }
 0x1cc   : > { %v1233_v52 = vpop.permute.xlu1 %1232  ;;  %v1600_v18 = vsel %vm258_vm0, %v4771_v30, %v1362_v48  ;;  %2698 = vmatmul.mubr.msk.bf16.gmra.mrb[28].mxu1 %vm258_vm0, %v4772_v32 }
 0x1cd   : > { %2701 = vmatprep.mubr.msk.bf16.mxu1 %vm258_vm0, %v4101_v19  ;;  %v1639_v20 = vsel %vm1492_vm5, %v1600_v18, %v4281_v23  ;;  %v1470_v5 = vsel %vm258_vm0, %v4773_v60, %v1233_v52 }
 0x1cf   : > { %v1429_v57 = vpop.permute.xlu0 %1428 }
 0x1d0   : > { %v1281_v8 = vpop.permute.xlu1 %1280  ;;  %v1679_v17 = vsel %vm1525_vm6, %v1639_v20, %v1429_v57 }
 0x1d1   : > { %v1510_v10 = vsel %vm1492_vm5, %v1470_v5, %v1281_v8  ;;  %1997 = vmatprep.mubr.bf16.mxu0 %v1679_v17 }
 0x1d2   : > { %v1551_v51 = vsel %vm1525_vm6, %v1510_v10, %v4287_v24 }
 0x1d3   : > { %1998 = vmatmul.mubr.bf16.gmra.mrb[32].mxu0 %v1551_v51  ;;  %v1364_v29 = vpop.permute.xlu0 %1363 }
 0x1d4   : > { %v1235_v56 = vpop.permute.xlu1 %1234  ;;  %2702 = vmatmul.mubr.msk.bf16.gmra.mrb[32].mxu1 %vm258_vm0, %v4277_v12  ;;  %v1603_v23 = vsel %vm258_vm0, %v4074_v38, %v1364_v29  ;;  %v4775_v12 = vld [vmem:[#allocation20_spill] sm:$0xff]  ;;  %v4776_v38 = vld [vmem:[#allocation11_spill] sm:$0xff] }
 0x1d5   : > { %2705 = vmatprep.mubr.msk.bf16.mxu1 %vm258_vm0, %v4084_v22  ;;  %v1473_v28 = vsel %vm258_vm0, %v4774_v7, %v1235_v56 }
 0x1d7   : > { %v1397_v19 = vpop.permute.xlu0 %1396 }
 0x1d8   : > { %v1283_v55 = vpop.permute.xlu1 %1282  ;;  %v1641_v9 = vsel %vm1492_vm5, %v1603_v23, %v1397_v19 }
 0x1d9   : > { %v1512_v61 = vsel %vm1492_vm5, %v1473_v28, %v1283_v55 }
 0x1db   : > { %v1431_v24 = vpop.permute.xlu0 %1430 }
 0x1dc   : > { %v1331_v4 = vpop.permute.xlu1 %1330  ;;  %v1682_v31 = vsel %vm1525_vm6, %v1641_v9, %v1431_v24  ;;  %2706 = vmatmul.mubr.msk.bf16.gmra.mrb[36].mxu1 %vm258_vm0, %v4775_v12 }
 0x1dd   : > { %v1554_v22 = vsel %vm1525_vm6, %v1512_v61, %v1331_v4  ;;  %2005 = vmatprep.mubr.bf16.mxu0 %v1682_v31  ;;  %2709 = vmatprep.mubr.msk.bf16.mxu1 %vm258_vm0, %v4776_v38 }
 0x1de   : > { %2006 = vmatmul.mubr.bf16.gmra.mrb[36].mxu0 %v1554_v22 }
 0x1df   : > { %v1366_v11 = vpop.permute.xlu0 %1365 }
 0x1e0   : > { %v1237_v15 = vpop.permute.xlu1 %1236  ;;  %v1606_v40 = vsel %vm258_vm0, %v4265_v1, %v1366_v11 }
 0x1e1   : > { %v1476_v26 = vsel %vm258_vm0, %v4021_v63, %v1237_v15 }
 0x1e3   : > { %v1399_v50 = vpop.permute.xlu0 %1398 }
 0x1e4   : > { %v1285_v46 = vpop.permute.xlu1 %1284  ;;  %2710 = vmatmul.mubr.msk.bf16.gmra.mrb[40].mxu1 %vm258_vm0, %v4777_v41  ;;  %v1643_v62 = vsel %vm1492_vm5, %v1606_v40, %v1399_v50 }
 0x1e5   : > { %2713 = vmatprep.mubr.msk.bf16.mxu1 %vm258_vm0, %v4778_v58  ;;  %v1514_v59 = vsel %vm1492_vm5, %v1476_v26, %v1285_v46 }
 0x1e7   : > { %v1433_v45 = vpop.permute.xlu0 %1432 }
 0x1e8   : > { %v1685_v3 = vsel %vm1525_vm6, %v1643_v62, %v1433_v45  ;;  %v1333_v43 = vpop.permute.xlu1 %1332 }
 0x1e9   : > { %2013 = vmatprep.mubr.bf16.mxu0 %v1685_v3  ;;  %v1557_v1 = vsel %vm1525_vm6, %v1514_v59, %v1333_v43  ;;  %v4532_v3 = vld [vmem:[%s4658_s4] ss:$0 sm:$0xff] }
 0x1ea   : > { %2014 = vmatmul.mubr.bf16.gmra.mrb[40].mxu0 %v1557_v1 }
 0x1eb   : > { %v1368_v42 = vpop.permute.xlu0 %1367 }
 0x1ec   : > { %2714 = vmatmul.mubr.msk.bf16.gmra.mrb[44].mxu1 %vm258_vm0, %v1199_v47  ;;  %v1239_v53 = vpop.permute.xlu1 %1238  ;;  %v1609_v63 = vsel %vm258_vm0, %v4068_v6, %v1368_v42 }
 0x1ed   : > { %v1479_v13 = vsel %vm258_vm0, %v4253_v16, %v1239_v53 }
 0x1ef   : > { %v1401_v14 = vpop.permute.xlu0 %1400 }
 0x1f0   : > { %v1287_v37 = vpop.permute.xlu1 %1286  ;;  %v1645_v33 = vsel %vm1492_vm5, %v1609_v63, %v1401_v14 }
 0x1f1   : > { %v1516_v34 = vsel %vm1492_vm5, %v1479_v13, %v1287_v37 }
 0x1f3   : > { %v1435_v0 = vpop.permute.xlu0 %1434 }
 0x1f4   : > { %v1688_v25 = vsel %vm1525_vm6, %v1645_v33, %v1435_v0  ;;  %v1335_v36 = vpop.permute.xlu1 %1334 }
 0x1f5   : > { %2021 = vmatprep.mubr.bf16.mxu0 %v1688_v25  ;;  %v1560_v39 = vsel %vm1525_vm6, %v1516_v34, %v1335_v36 }
 0x1f6   : > { %2022 = vmatmul.mubr.bf16.gmra.mrb[44].mxu0 %v1560_v39 }
 0x249   : > { %v2567_v35 = vpop.f32.mrb[0].mxu0 }
 0x24a   : > { %v2568_v47 = vpop.f32.mrb[1].mxu0 }
 0x24b   : > { %v2569_v6 = vadd.f32 %v2568_v47, %v2567_v35  ;;  %v2570_v2 = vpop.f32.mrb[2].mxu0 }
 0x24c   : > { %v2571_v27 = vpop.f32.mrb[3].mxu0 }
 0x24d   : > { %v2572_v44 = vadd.f32 %v2571_v27, %v2570_v2  ;;  %v1936_v63 = vadd.f32 %v2569_v6, %v4532_v3 }
 0x24f   : > { %v1939_v39 = vadd.f32 %v2572_v44, %v4532_v3 }
 0x251   : > { %v2639_v49 = vpop.f32.mrb[0].mxu1 }
 0x252   : > { %v2640_v54 = vpop.f32.mrb[1].mxu1 }
 0x253   : > { %v4511_v21 = vadd.f32 %v2640_v54, %v2639_v49  ;;  %v2642_v16 = vpop.f32.mrb[2].mxu1 }
 0x254   : > { %v2643_v48 = vpop.f32.mrb[3].mxu1 }
 0x255   : > { %v4513_v52 = vadd.f32 %v2643_v48, %v2642_v16 }
 0x259   : > { %v2573_v30 = vpop.f32.mrb[4].mxu0 }
 0x25a   : > { %v2574_v18 = vpop.f32.mrb[5].mxu0 }
 0x25b   : > { %v2575_v32 = vadd.f32 %v2574_v18, %v2573_v30  ;;  %v2576_v57 = vpop.f32.mrb[6].mxu0 }
 0x25c   : > { %v2577_v20 = vpop.f32.mrb[7].mxu0 }
 0x25d   : > { %v2578_v60 = vadd.f32 %v2577_v20, %v2576_v57  ;;  %v1944_v43 = vadd.f32 %v2575_v32, %v4532_v3 }
 0x25f   : > { %v1947_v13 = vadd.f32 %v2578_v60, %v4532_v3 }
 0x261   : > { %v2645_v5 = vpop.f32.mrb[4].mxu1 }
 0x262   : > { %v2646_v8 = vpop.f32.mrb[5].mxu1 }
 0x263   : > { %v4515_v17 = vadd.f32 %v2646_v8, %v2645_v5  ;;  %v2648_v10 = vpop.f32.mrb[6].mxu1 }
 0x264   : > { %v2649_v51 = vpop.f32.mrb[7].mxu1 }
 0x265   : > { %v4517_v29 = vadd.f32 %v2649_v51, %v2648_v10 }
 0x269   : > { %v2579_v56 = vpop.f32.mrb[8].mxu0 }
 0x26a   : > { %v2580_v23 = vpop.f32.mrb[9].mxu0 }
 0x26b   : > { %v2581_v19 = vadd.f32 %v2580_v23, %v2579_v56  ;;  %v2582_v55 = vpop.f32.mrb[10].mxu0 }
 0x26c   : > { %v2583_v9 = vpop.f32.mrb[11].mxu0 }
 0x26d   : > { %v4519_v7 = vadd.f32 %v2583_v9, %v2582_v55  ;;  %v1952_v32 = vadd.f32 %v2581_v19, %v4532_v3 }
 0x26f   : > { %v1955_v23 = vadd.f32 %v4519_v7, %v4532_v3 }
 0x271   : > { %v2651_v28 = vpop.f32.mrb[8].mxu1 }
 0x272   : > { %v2652_v24 = vpop.f32.mrb[9].mxu1 }
 0x273   : > { %v4521_v61 = vadd.f32 %v2652_v24, %v2651_v28  ;;  %v2654_v4 = vpop.f32.mrb[10].mxu1 }
 0x274   : > { %v2655_v31 = vpop.f32.mrb[11].mxu1 }
 0x275   : > { %v4523_v12 = vadd.f32 %v2655_v31, %v2654_v4 }
 0x279   : > { %v2585_v22 = vpop.f32.mrb[12].mxu0 }
 0x27a   : > { %v2586_v38 = vpop.f32.mrb[13].mxu0 }
 0x27b   : > { %v2587_v11 = vadd.f32 %v2586_v38, %v2585_v22  ;;  %v2588_v15 = vpop.f32.mrb[14].mxu0 }
 0x27c   : > { %v2589_v40 = vpop.f32.mrb[15].mxu0 }
 0x27d   : > { %v2590_v50 = vadd.f32 %v2589_v40, %v2588_v15  ;;  %v1960_v48 = vadd.f32 %v2587_v11, %v4532_v3 }
 0x27f   : > { %v2657_v46 = vpop.f32.mrb[12].mxu1  ;;  %v1963_v5 = vadd.f32 %v2590_v50, %v4532_v3 }
 0x280   : > { %v2658_v41 = vpop.f32.mrb[13].mxu1 }
 0x281   : > { %v4525_v62 = vadd.f32 %v2658_v41, %v2657_v46  ;;  %v2660_v58 = vpop.f32.mrb[14].mxu1 }
 0x282   : > { %v2661_v26 = vpop.f32.mrb[15].mxu1 }
 0x283   : > { %v4527_v45 = vadd.f32 %v2661_v26, %v2660_v58 }
 0x286   : > { %v2591_v59 = vpop.f32.mrb[16].mxu0 }
 0x287   : > { %v2592_v1 = vpop.f32.mrb[17].mxu0  ;;  %v2687_v42 = vpop.f32.mrb[16].mxu1 }
 0x288   : > { %v2593_v53 = vadd.f32 %v2592_v1, %v2591_v59  ;;  %v2594_v14 = vpop.f32.mrb[18].mxu0  ;;  %v2105_v37 = vadd.f32 %v2687_v42, %v1944_v43  ;;  %v2096_v33 = vpop.f32.mrb[17].mxu1 }
 0x289   : > { %v2595_v0 = vpop.f32.mrb[19].mxu0  ;;  %v2097_v25 = vadd.f32 %v2096_v33, %v1936_v63  ;;  %v2688_v34 = vpop.f32.mrb[18].mxu1 }
 0x28a   : > { %v2596_v36 = vadd.f32 %v2595_v0, %v2594_v14  ;;  %v2521_v35 = vpack.c.bf16 %v2105_v37, %v2105_v37  ;;  %v2108_v47 = vadd.f32 %v2688_v34, %v1947_v13  ;;  %v2099_v6 = vpop.f32.mrb[19].mxu1  ;;  %v1968_v40 = vadd.f32 %v2593_v53, %v4532_v3 }
 0x28b   : > { %v2519_v2 = vpack.c.bf16 %v2097_v25, %v2097_v25  ;;  %v2100_v27 = vadd.f32 %v2099_v6, %v1939_v39 }
 0x28c   : > { %2354 = vst.msk [vmem:[%s4541_s30 + $0x8] sm:$0xf] %vm2351_vm7, %v2521_v35  ;;  %v2522_v49 = vpack.c.bf16 %v2108_v47, %v2108_v47  ;;  %v1971_v42 = vadd.f32 %v2596_v36, %v4532_v3 }
 0x28d   : > { %2352 = vst.msk [vmem:[%s4541_s30] sm:$0xf] %vm2351_vm7, %v2519_v2  ;;  %v2520_v54 = vpack.c.bf16 %v2100_v27, %v2100_v27 }
 0x28e   : > { %v2597_v16 = vpop.f32.mrb[20].mxu0  ;;  %2355 = vst.msk [vmem:[%s4541_s30 + $0xc] sm:$0xf] %vm2351_vm7, %v2522_v49 }
 0x28f   : > { %v2598_v30 = vpop.f32.mrb[21].mxu0  ;;  %2353 = vst.msk [vmem:[%s4541_s30 + $0x4] sm:$0xf] %vm2351_vm7, %v2520_v54  ;;  %v2691_v44 = vpop.f32.mrb[20].mxu1 }
 0x290   : > { %v2599_v18 = vadd.f32 %v2598_v30, %v2597_v16  ;;  %v2600_v57 = vpop.f32.mrb[22].mxu0  ;;  %v2121_v20 = vadd.f32 %v2691_v44, %v1960_v48  ;;  %v2112_v60 = vpop.f32.mrb[21].mxu1 }
 0x291   : > { %v2601_v8 = vpop.f32.mrb[23].mxu0  ;;  %v2113_v10 = vadd.f32 %v2112_v60, %v1952_v32  ;;  %v2692_v51 = vpop.f32.mrb[22].mxu1 }
 0x292   : > { %v2602_v56 = vadd.f32 %v2601_v8, %v2600_v57  ;;  %v2525_v55 = vpack.c.bf16 %v2121_v20, %v2121_v20  ;;  %v2124_v9 = vadd.f32 %v2692_v51, %v1963_v5  ;;  %v2115_v28 = vpop.f32.mrb[23].mxu1  ;;  %v1976_v38 = vadd.f32 %v2599_v18, %v4532_v3 }
 0x293   : > { %v2523_v24 = vpack.c.bf16 %v2113_v10, %v2113_v10  ;;  %v2116_v19 = vadd.f32 %v2115_v28, %v1955_v23 }
 0x294   : > { %2358 = vst.msk [vmem:[%s4541_s30 + $0x18] sm:$0xf] %vm2351_vm7, %v2525_v55  ;;  %v2526_v4 = vpack.c.bf16 %v2124_v9, %v2124_v9  ;;  %v1979_v58 = vadd.f32 %v2602_v56, %v4532_v3 }
 0x295   : > { %2356 = vst.msk [vmem:[%s4541_s30 + $0x10] sm:$0xf] %vm2351_vm7, %v2523_v24  ;;  %v2524_v31 = vpack.c.bf16 %v2116_v19, %v2116_v19 }
 0x296   : > { %v2603_v22 = vpop.f32.mrb[24].mxu0  ;;  %2359 = vst.msk [vmem:[%s4541_s30 + $0x1c] sm:$0xf] %vm2351_vm7, %v2526_v4 }
 0x297   : > { %v2604_v11 = vpop.f32.mrb[25].mxu0  ;;  %2357 = vst.msk [vmem:[%s4541_s30 + $0x14] sm:$0xf] %vm2351_vm7, %v2524_v31  ;;  %v2695_v7 = vpop.f32.mrb[24].mxu1 }
 0x298   : > { %v2605_v15 = vadd.f32 %v2604_v11, %v2603_v22  ;;  %v2606_v50 = vpop.f32.mrb[26].mxu0  ;;  %v2137_v46 = vadd.f32 %v2695_v7, %v1976_v38  ;;  %v2128_v41 = vpop.f32.mrb[25].mxu1 }
 0x299   : > { %v2607_v26 = vpop.f32.mrb[27].mxu0  ;;  %v2129_v59 = vadd.f32 %v2128_v41, %v1968_v40  ;;  %v2696_v43 = vpop.f32.mrb[26].mxu1 }
 0x29a   : > { %v2608_v1 = vadd.f32 %v2607_v26, %v2606_v50  ;;  %v2529_v63 = vpack.c.bf16 %v2137_v46, %v2137_v46  ;;  %v2140_v14 = vadd.f32 %v2696_v43, %v1979_v58  ;;  %v2131_v37 = vpop.f32.mrb[27].mxu1  ;;  %v1984_v36 = vadd.f32 %v2605_v15, %v4532_v3 }
 0x29b   : > { %v2527_v33 = vpack.c.bf16 %v2129_v59, %v2129_v59  ;;  %v2132_v13 = vadd.f32 %v2131_v37, %v1971_v42 }
 0x29c   : > { %2362 = vst.msk [vmem:[%s4541_s30 + $0x28] sm:$0xf] %vm2351_vm7, %v2529_v63  ;;  %v2530_v53 = vpack.c.bf16 %v2140_v14, %v2140_v14  ;;  %v1987_v48 = vadd.f32 %v2608_v1, %v4532_v3  ;;  %v2040_v14 = vadd.f32 %v4515_v17, %v4532_v3 }
 0x29d   : > { %2360 = vst.msk [vmem:[%s4541_s30 + $0x20] sm:$0xf] %vm2351_vm7, %v2527_v33  ;;  %v2528_v0 = vpack.c.bf16 %v2132_v13, %v2132_v13 }
 0x29e   : > { %v2609_v25 = vpop.f32.mrb[28].mxu0  ;;  %2363 = vst.msk [vmem:[%s4541_s30 + $0x2c] sm:$0xf] %vm2351_vm7, %v2530_v53  ;;  %v2032_v53 = vadd.f32 %v4511_v21, %v4532_v3 }
 0x29f   : > { %v2610_v34 = vpop.f32.mrb[29].mxu0  ;;  %2361 = vst.msk [vmem:[%s4541_s30 + $0x24] sm:$0xf] %vm2351_vm7, %v2528_v0  ;;  %v2699_v39 = vpop.f32.mrb[28].mxu1 }
 0x2a0   : > { %v2611_v35 = vadd.f32 %v2610_v34, %v2609_v25  ;;  %v2612_v47 = vpop.f32.mrb[30].mxu0  ;;  %v2144_v6 = vpop.f32.mrb[29].mxu1  ;;  %v2043_v34 = vadd.f32 %v4517_v29, %v4532_v3 }
 0x2a1   : > { %v2613_v2 = vpop.f32.mrb[31].mxu0  ;;  %v2145_v49 = vadd.f32 %v2144_v6, %v1984_v36  ;;  %v2700_v54 = vpop.f32.mrb[30].mxu1 }
 0x2a2   : > { %v1992_v27 = vadd.f32 %v2611_v35, %v4532_v3  ;;  %v2614_v16 = vadd.f32 %v2613_v2, %v2612_v47  ;;  %v2147_v30 = vpop.f32.mrb[31].mxu1  ;;  %v2035_v47 = vadd.f32 %v4513_v52, %v4532_v3 }
 0x2a3   : > { %v2531_v18 = vpack.c.bf16 %v2145_v49, %v2145_v49  ;;  %v2148_v57 = vadd.f32 %v2147_v30, %v1987_v48  ;;  %v2056_v30 = vadd.f32 %v4525_v62, %v4532_v3 }
 0x2a4   : > { %v2153_v44 = vadd.f32 %v2699_v39, %v1992_v27  ;;  %v1995_v32 = vadd.f32 %v2614_v16, %v4532_v3 }
 0x2a5   : > { %2364 = vst.msk [vmem:[%s4541_s30 + $0x30] sm:$0xf] %vm2351_vm7, %v2531_v18  ;;  %v2532_v5 = vpack.c.bf16 %v2148_v57, %v2148_v57  ;;  %v2048_v57 = vadd.f32 %v4521_v61, %v4532_v3 }
 0x2a6   : > { %v2533_v20 = vpack.c.bf16 %v2153_v44, %v2153_v44  ;;  %v2156_v60 = vadd.f32 %v2700_v54, %v1995_v32  ;;  %v2615_v8 = vpop.f32.mrb[32].mxu0 }
 0x2a7   : > { %v2616_v10 = vpop.f32.mrb[33].mxu0  ;;  %2365 = vst.msk [vmem:[%s4541_s30 + $0x34] sm:$0xf] %vm2351_vm7, %v2532_v5  ;;  %v2703_v55 = vpop.f32.mrb[32].mxu1 }
 0x2a8   : > { %2366 = vst.msk [vmem:[%s4541_s30 + $0x38] sm:$0xf] %vm2351_vm7, %v2533_v20  ;;  %v2534_v51 = vpack.c.bf16 %v2156_v60, %v2156_v60  ;;  %v2617_v56 = vadd.f32 %v2616_v10, %v2615_v8  ;;  %v2618_v23 = vpop.f32.mrb[34].mxu0  ;;  %v2160_v28 = vpop.f32.mrb[33].mxu1  ;;  %v2059_v8 = vadd.f32 %v4527_v45, %v4532_v3 }
 0x2a9   : > { %v2619_v9 = vpop.f32.mrb[35].mxu0  ;;  %v2704_v4 = vpop.f32.mrb[34].mxu1 }
 0x2aa   : > { %2367 = vst.msk [vmem:[%s4541_s30 + $0x3c] sm:$0xf] %vm2351_vm7, %v2534_v51  ;;  %v2620_v24 = vadd.f32 %v2619_v9, %v2618_v23  ;;  %v2000_v19 = vadd.f32 %v2617_v56, %v4532_v3  ;;  %v2163_v31 = vpop.f32.mrb[35].mxu1  ;;  %v2051_v23 = vadd.f32 %v4523_v12, %v4532_v3 }
 0x2ac   : > { %v2161_v22 = vadd.f32 %v2160_v28, %v2000_v19  ;;  %v2003_v38 = vadd.f32 %v2620_v24, %v4532_v3 }
 0x2ae   : > { %v2535_v11 = vpack.c.bf16 %v2161_v22, %v2161_v22  ;;  %v2164_v7 = vadd.f32 %v2163_v31, %v2003_v38 }
 0x2af   : > { %v4593_v40 = vpop.f32.mrb[36].mxu1 }
 0x2b0   : > { %2368 = vst.msk [vmem:[%s4541_s30 + $0x40] sm:$0xf] %vm2351_vm7, %v2535_v11  ;;  %v2536_v15 = vpack.c.bf16 %v2164_v7, %v2164_v7  ;;  %v2176_v50 = vpop.f32.mrb[37].mxu1 }
 0x2b1   : > { %v2621_v46 = vpop.f32.mrb[36].mxu0  ;;  %v4597_v41 = vpop.f32.mrb[38].mxu1 }
 0x2b2   : > { %2369 = vst.msk [vmem:[%s4541_s30 + $0x44] sm:$0xf] %vm2351_vm7, %v2536_v15  ;;  %v2622_v58 = vpop.f32.mrb[37].mxu0  ;;  %v2179_v26 = vpop.f32.mrb[39].mxu1 }
 0x2b3   : > { %v2623_v59 = vadd.f32 %v2622_v58, %v2621_v46  ;;  %v2624_v43 = vpop.f32.mrb[38].mxu0 }
 0x2b4   : > { %v2625_v1 = vpop.f32.mrb[39].mxu0 }
 0x2b5   : > { %v2008_v42 = vadd.f32 %v2623_v59, %v4532_v3  ;;  %v2626_v63 = vadd.f32 %v2625_v1, %v2624_v43 }
 0x2b7   : > { %v2169_v37 = vadd.f32 %v2703_v55, %v2008_v42  ;;  %v2011_v33 = vadd.f32 %v2626_v63, %v4532_v3  ;;  %v2711_v13 = vpop.f32.mrb[40].mxu1 }
 0x2b8   : > { %v2201_v0 = vadd.f32 %v2711_v13, %v2040_v14  ;;  %v2192_v25 = vpop.f32.mrb[41].mxu1 }
 0x2b9   : > { %v2537_v39 = vpack.c.bf16 %v2169_v37, %v2169_v37  ;;  %v2172_v35 = vadd.f32 %v2704_v4, %v2011_v33  ;;  %v2193_v36 = vadd.f32 %v2192_v25, %v2032_v53  ;;  %v2712_v17 = vpop.f32.mrb[42].mxu1 }
 0x2ba   : > { %v2545_v6 = vpack.c.bf16 %v2201_v0, %v2201_v0  ;;  %v2204_v2 = vadd.f32 %v2712_v17, %v2043_v34  ;;  %v2195_v21 = vpop.f32.mrb[43].mxu1 }
 0x2bb   : > { %2370 = vst.msk [vmem:[%s4541_s30 + $0x48] sm:$0xf] %vm2351_vm7, %v2537_v39  ;;  %v2538_v27 = vpack.c.bf16 %v2172_v35, %v2172_v35  ;;  %v2543_v49 = vpack.c.bf16 %v2193_v36, %v2193_v36  ;;  %v2196_v54 = vadd.f32 %v2195_v21, %v2035_v47 }
 0x2bc   : > { %2378 = vst.msk [vmem:[%s4541_s30 + $0x68] sm:$0xf] %vm2351_vm7, %v2545_v6  ;;  %v2546_v29 = vpack.c.bf16 %v2204_v2, %v2204_v2 }
 0x2bd   : > { %2371 = vst.msk [vmem:[%s4541_s30 + $0x4c] sm:$0xf] %vm2351_vm7, %v2538_v27  ;;  %2376 = vst.msk [vmem:[%s4541_s30 + $0x60] sm:$0xf] %vm2351_vm7, %v2543_v49  ;;  %v2544_v16 = vpack.c.bf16 %v2196_v54, %v2196_v54  ;;  %v2627_v48 = vpop.f32.mrb[40].mxu0 }
 0x2be   : > { %2379 = vst.msk [vmem:[%s4541_s30 + $0x6c] sm:$0xf] %vm2351_vm7, %v2546_v29  ;;  %v2628_v52 = vpop.f32.mrb[41].mxu0 }
 0x2bf   : > { %2377 = vst.msk [vmem:[%s4541_s30 + $0x64] sm:$0xf] %vm2351_vm7, %v2544_v16  ;;  %v2629_v44 = vadd.f32 %v2628_v52, %v2627_v48  ;;  %v2715_v18 = vpop.f32.mrb[44].mxu1  ;;  %v2630_v32 = vpop.f32.mrb[42].mxu0 }
 0x2c0   : > { %v2217_v20 = vadd.f32 %v2715_v18, %v2056_v30  ;;  %v2208_v60 = vpop.f32.mrb[45].mxu1  ;;  %v2631_v5 = vpop.f32.mrb[43].mxu0 }
 0x2c1   : > { %v2016_v10 = vadd.f32 %v2629_v44, %v4532_v3  ;;  %v2209_v51 = vadd.f32 %v2208_v60, %v2048_v57  ;;  %v2632_v62 = vadd.f32 %v2631_v5, %v2630_v32  ;;  %v2716_v56 = vpop.f32.mrb[46].mxu1 }
 0x2c2   : > { %v2549_v55 = vpack.c.bf16 %v2217_v20, %v2217_v20  ;;  %v2220_v61 = vadd.f32 %v2716_v56, %v2059_v8  ;;  %v2211_v9 = vpop.f32.mrb[47].mxu1 }
 0x2c3   : > { %v2177_v28 = vadd.f32 %v2176_v50, %v2016_v10  ;;  %v2547_v24 = vpack.c.bf16 %v2209_v51, %v2209_v51  ;;  %v2019_v45 = vadd.f32 %v2632_v62, %v4532_v3  ;;  %v2212_v19 = vadd.f32 %v2211_v9, %v2051_v23 }
 0x2c4   : > { %2382 = vst.msk [vmem:[%s4541_s30 + $0x78] sm:$0xf] %vm2351_vm7, %v2549_v55  ;;  %v2550_v4 = vpack.c.bf16 %v2220_v61, %v2220_v61 }
 0x2c5   : > { %v2539_v31 = vpack.c.bf16 %v2177_v28, %v2177_v28  ;;  %2380 = vst.msk [vmem:[%s4541_s30 + $0x70] sm:$0xf] %vm2351_vm7, %v2547_v24  ;;  %v2180_v22 = vadd.f32 %v2179_v26, %v2019_v45  ;;  %v2548_v38 = vpack.c.bf16 %v2212_v19, %v2212_v19 }
 0x2c6   : > { %2383 = vst.msk [vmem:[%s4541_s30 + $0x7c] sm:$0xf] %vm2351_vm7, %v2550_v4 }
 0x2c7   : > { %2372 = vst.msk [vmem:[%s4541_s30 + $0x50] sm:$0xf] %vm2351_vm7, %v2539_v31  ;;  %v2540_v12 = vpack.c.bf16 %v2180_v22, %v2180_v22  ;;  %2381 = vst.msk [vmem:[%s4541_s30 + $0x74] sm:$0xf] %vm2351_vm7, %v2548_v38 }
 0x2c9   : > { %2373 = vst.msk [vmem:[%s4541_s30 + $0x54] sm:$0xf] %vm2351_vm7, %v2540_v12  ;;  %v2633_v11 = vpop.f32.mrb[44].mxu0 }
 0x2ca   : > { %v2634_v7 = vpop.f32.mrb[45].mxu0 }
 0x2cb   : > { %v2635_v15 = vadd.f32 %v2634_v7, %v2633_v11  ;;  %v2636_v50 = vpop.f32.mrb[46].mxu0 }
 0x2cc   : > { %v2637_v46 = vpop.f32.mrb[47].mxu0 }
 0x2cd   : > { %v2024_v58 = vadd.f32 %v2635_v15, %v4532_v3  ;;  %v2638_v26 = vadd.f32 %v2637_v46, %v2636_v50 }
 0x2cf   : > { %v2185_v59 = vadd.f32 %v4593_v40, %v2024_v58  ;;  %v2027_v43 = vadd.f32 %v2638_v26, %v4532_v3 }
 0x2d1   : > { %v2541_v1 = vpack.c.bf16 %v2185_v59, %v2185_v59  ;;  %v2188_v42 = vadd.f32 %v4597_v41, %v2027_v43 }
 0x2d3   : > { %2374 = vst.msk [vmem:[%s4541_s30 + $0x58] sm:$0xf] %vm2351_vm7, %v2541_v1  ;;  %v2542_v63 = vpack.c.bf16 %v2188_v42, %v2188_v42 }
 0x2d5   : > { %2375 = vst.msk [vmem:[%s4541_s30 + $0x5c] sm:$0xf] %vm2351_vm7, %v2542_v63 }
 0x2d6 PF: > { %s15_s18 = sadd.s32 1, %s2906_s18  }
 0x2d7   : > { %p12_p4 = scmp.ge.s32.totalorder %s15_s18, 4  }
 0x2d9   :  { %14 = sbr.rel (!%p12_p4) target bundleno = 1 (0x1), region = 72 }

</bundles_post_ra>
